<compile_context>
chip_gen: v7x
topology: tpu7x:2x2x1
jax: 0.10.0
libtpu: 0.0.40
codegen_flags: <defaults>
</compile_context>

<pallas_src>
import functools

import jax
import jax.numpy as jnp
from jax.experimental import pallas as pl
from jax.experimental.pallas import tpu as pltpu


# ------------------------------------------------------------------ kernel ---

def _fused_kernel(x_ref, sel_ref, wc_ref, wfc_ref, bfc_ref,
                  t_ref, wt_ref, bt_ref,
                  w1_ref, b1_ref, w2r_ref, b2_ref, o_ref):
    # x_ref:   (C, TILE_B*HW)       bf16  image chunk, lane-dense (HW-major segments)
    # sel_ref: (TILE_B, TILE_B*HW)  bf16  block-indicator for the global pool
    # wc_ref:  (F, C)               bf16  1x1-conv weight
    # wfc_ref: (F, D)               bf16  CNN-head weight, 1/HW pool scale pre-folded
    # bfc_ref: (1, D)               f32
    # t_ref:   (TILE_B, Dt)         f32   tabular chunk
    # wt_ref:  (Dt, D)              bf16
    # bt_ref:  (1, D)               f32
    # w1_ref:  (2, D, D)            bf16  fusion fc1 weight split into concat halves
    # b1_ref:  (1, D)               f32
    # w2r_ref: (1, D)               bf16  fc2 weight laid out as a row
    # b2_ref:  (1,)                 f32   SMEM scalar
    # o_ref:   (1, 1, TILE_B)       f32   fc2 output, batch on lanes

    # ---- CNN branch: 1x1 conv (one MXU pass) + ReLU + selector-matmul pool ----
    y = jnp.dot(wc_ref[...], x_ref[...],
                preferred_element_type=jnp.float32)            # (F, TILE_B*HW)
    y = jnp.maximum(y, 0.0)                                    # ReLU in f32 (v5e-safe)
    # pooled[b, f] = sum_p sel[b, p] * relu(y)[f, p]  (A @ Bᵀ contraction on the MXU)
    pooled = jax.lax.dot_general(
        sel_ref[...], y.astype(jnp.bfloat16),
        dimension_numbers=(((1,), (1,)), ((), ())),
        preferred_element_type=jnp.float32)                    # (TILE_B, F)
    img_feat = jnp.dot(pooled.astype(jnp.bfloat16), wfc_ref[...],
                       preferred_element_type=jnp.float32) + bfc_ref[...]
    img_feat = jnp.maximum(img_feat, 0.0)                      # (TILE_B, D) f32

    # ---- tabular branch: Linear + ReLU ----
    tab_feat = jnp.dot(t_ref[...].astype(jnp.bfloat16), wt_ref[...],
                       preferred_element_type=jnp.float32) + bt_ref[...]
    tab_feat = jnp.maximum(tab_feat, 0.0)                      # (TILE_B, D) f32

    # ---- fusion head: concat -> fc1 -> ReLU -> fc2 ----
    # concat([img, tab], dim=1) @ W1  ==  img @ W1_top + tab @ W1_bot
    h = (jnp.dot(img_feat.astype(jnp.bfloat16), w1_ref[0],
                 preferred_element_type=jnp.float32)
         + jnp.dot(tab_feat.astype(jnp.bfloat16), w1_ref[1],
                   preferred_element_type=jnp.float32)
         + b1_ref[...])
    h = jnp.maximum(h, 0.0)                                    # (TILE_B, D) f32
    # fc2 (D -> 1), lane-dense: w2_row (1,D) x h (TILE_B,D) contracted on D.
    row = jax.lax.dot_general(
        w2r_ref[...], h.astype(jnp.bfloat16),
        dimension_numbers=(((1,), (1,)), ((), ())),
        preferred_element_type=jnp.float32) + b2_ref[0]        # (1, TILE_B)
    o_ref[...] = row[None]                                     # (1, 1, TILE_B)


# ---------------------------------------------------------------- wrappers ---

def prepare_params(p, hw):
    """One-time parameter prep (outside the hot path)."""
    feat = p["w1"].shape[1]
    return {
        "wc":  p["wc"].astype(jnp.bfloat16),                  # (F, C)
        # Folding 1/(H*W) into wfc is exact only when H*W is a power of two
        # (pure exponent shift); otherwise it adds bf16 rounding to the weights.
        "wfc": (p["wfc"] / hw).astype(jnp.bfloat16),          # (F, D)
        "bfc": p["bfc"].astype(jnp.float32),                  # (1, D)
        "wt":  p["wt"].astype(jnp.bfloat16),                  # (Dt, D)
        "bt":  p["bt"].astype(jnp.float32),                   # (1, D)
        # (2D, D) -> (2, D, D): concat halves become tile-aligned ref loads.
        "w1":  p["w1"].reshape(2, feat, feat).astype(jnp.bfloat16),
        "b1":  p["b1"].astype(jnp.float32),                   # (1, D)
        "w2r": p["w2"].T.astype(jnp.bfloat16),                # (1, D) row
        "b2":  p["b2"].reshape(1).astype(jnp.float32),        # (1,) -> 1-D SMEM scalar
        # TODO(synk): on v7x the bf16 weights could be stored fp8 (e4m3) to halve
        # the weight DMA again; bf16 kept here as the portable v5e/v6e/v7x path.
    }


@functools.partial(jax.jit, static_argnames=("tile_b",))
def multimodal_forward(imgs_nchw, tarb, kp, *, tile_b=8):
    # tile_b: batch rows per grid step. 8 keeps the toy demo small; for real
    # batched inference use 128 (v5e) / 256 (v6e/v7x) so the MXU M-dim fills —
    # below that the kernel is latency/weight-DMA-bound by construction.
    B, C, H, W = imgs_nchw.shape
    HW = H * W
    Dt = tarb.shape[1]
    F = kp["wc"].shape[0]
    D = kp["wfc"].shape[1]

    n_chunks = pl.cdiv(B, tile_b)
    B_pad = n_chunks * tile_b

    # Lane-dense image slab: (B,C,H,W) -> (C, B_pad*HW); transpose done once in XLA.
    x = imgs_nchw.reshape(B, C, HW)
    x = jnp.pad(x, ((0, B_pad - B), (0, 0), (0, 0)))
    x = jnp.transpose(x, (1, 0, 2)).reshape(C, B_pad * HW).astype(jnp.bfloat16)
    t = jnp.pad(tarb, ((0, B_pad - B), (0, 0))).astype(jnp.float32)

    # Block indicator: pools each HW-lane segment with a single MXU contraction.
    sel = (jnp.arange(tile_b * HW) // HW == jnp.arange(tile_b)[:, None]
           ).astype(jnp.bfloat16)                              # (tile_b, tile_b*HW)

    flops = 2 * B_pad * (HW * C * F + HW * F * tile_b + F * D + Dt * D
                         + 2 * D * D + D)
    operands = (x, sel, t) + tuple(kp.values())
    bytes_accessed = (sum(int(a.size) * a.dtype.itemsize for a in operands)
                      + B_pad * 4)

    const = lambda i: (0, 0)   # weight blocks: DMA'd once, VMEM-resident across steps

    out = pl.pallas_call(
        _fused_kernel,
        out_shape=jax.ShapeDtypeStruct((n_chunks, 1, tile_b), jnp.float32),
        grid=(n_chunks,),
        in_specs=[
            pl.BlockSpec((C, tile_b * HW), lambda i: (0, i)),      # x slab (per chunk)
            pl.BlockSpec((tile_b, tile_b * HW), const),            # pool selector
            pl.BlockSpec((F, C), const),                           # wc
            pl.BlockSpec((F, D), const),                           # wfc
            pl.BlockSpec((1, D), const),                           # bfc
            pl.BlockSpec((tile_b, Dt), lambda i: (i, 0)),          # tab chunk
            pl.BlockSpec((Dt, D), const),                          # wt
            pl.BlockSpec((1, D), const),                           # bt
            pl.BlockSpec((2, D, D), lambda i: (0, 0, 0)),          # w1 halves
            pl.BlockSpec((1, D), const),                           # b1
            pl.BlockSpec((1, D), const),                           # w2 row
            pl.BlockSpec(memory_space=pltpu.MemorySpace.SMEM),     # b2 scalar (1-D)
        ],
        out_specs=pl.BlockSpec((1, 1, tile_b), lambda i: (i, 0, 0)),
        compiler_params=pltpu.CompilerParams(
            dimension_semantics=("parallel",)),   # v7x: chunks shard across 2 TCs
        cost_estimate=pl.CostEstimate(flops=flops, transcendentals=0,
                                      bytes_accessed=bytes_accessed),
    )(x, sel, kp["wc"], kp["wfc"], kp["bfc"],
      t, kp["wt"], kp["bt"],
      kp["w1"], kp["b1"], kp["w2r"], kp["b2"])

    # VMEM note: per-step live blocks total <1 MiB (w1 512 KiB bf16 dominates),
    # far under default scoped limits (v5e 16 MiB, v6e/v7x 32 MiB; v7x physical
    # VMEM is 64 MiB/TC). If FEAT / tile_b are scaled up, remember BlockSpec
    # double-buffers each *varying* input and size tiles against the v7x 64 MiB
    # budget (set pltpu.CompilerParams(vmem_limit_bytes=...) as needed).
    return out.reshape(B_pad)[:B].reshape(B, 1)


# --------------------------------------------------------------- reference ---

def multimodal_reference(imgs_nchw, tarb, p):
    """Pure-JAX f32 reference with the original op ordering (mean pool,
    explicit concat of the two 512-d features)."""
    B, C, H, W = imgs_nchw.shape
    x = imgs_nchw.reshape(B, C, H * W)
    y = jnp.maximum(jnp.einsum("fc,bcp->bfp", p["wc"], x), 0.0)
    pooled = jnp.mean(y, axis=2)                               # (B, F)
    img_feat = jnp.maximum(pooled @ p["wfc"] + p["bfc"], 0.0)
    tab_feat = jnp.maximum(tarb @ p["wt"] + p["bt"], 0.0)
    fused = jnp.concatenate([img_feat, tab_feat], axis=1)      # (B, 1024)
    h = jnp.maximum(fused @ p["w1"] + p["b1"], 0.0)
    return h @ p["w2"] + p["b2"]


# -------------------------------------------------------------------- main ---

if __name__ == "__main__":
    B, C, H, W = 2, 4, 16, 16
    D_TAB = 8
    F_CONV = 64
    FEAT = 512            # each backbone emits 512 -> fc1 input is 1024

    key = jax.random.PRNGKey(0)
    ks = jax.random.split(key, 13)

    imgs = jax.random.normal(ks[0], (B, C, H, W), jnp.float32)    # NCHW (PyTorch)
    tarb = jax.random.normal(ks[1], (B, D_TAB), jnp.float32)

    def bf16_rep(a):
        # keep master weights bf16-representable so the kernel's bf16 weight
        # storage is lossless (only activation casts differ from the reference)
        return a.astype(jnp.bfloat16).astype(jnp.float32)

    params = {
        "wc":  bf16_rep(jax.random.normal(ks[2], (F_CONV, C), jnp.float32) * 0.10),
        "wfc": bf16_rep(jax.random.normal(ks[3], (F_CONV, FEAT), jnp.float32) * 0.05),
        "bfc": jax.random.normal(ks[4], (1, FEAT), jnp.float32) * 0.01,
        "wt":  bf16_rep(jax.random.normal(ks[5], (D_TAB, FEAT), jnp.float32) * 0.10),
        "bt":  jax.random.normal(ks[6], (1, FEAT), jnp.float32) * 0.01,
        "w1":  bf16_rep(jax.random.normal(ks[7], (2 * FEAT, FEAT), jnp.float32) * 0.03),
        "b1":  jax.random.normal(ks[8], (1, FEAT), jnp.float32) * 0.01,
        "w2":  bf16_rep(jax.random.normal(ks[9], (FEAT, 1), jnp.float32) * 0.05),
        "b2":  jax.random.normal(ks[10], (1, 1), jnp.float32) * 0.01,
    }

    kernel_params = prepare_params(params, H * W)

    # Primary test at the spec's toy batch (single grid step).
    out = jax.block_until_ready(multimodal_forward(imgs, tarb, kernel_params))
    ref = multimodal_reference(imgs, tarb, params)
    assert out.shape == (B, 1), out.shape
    assert jnp.allclose(out, ref, atol=2e-2, rtol=2e-2), (out, ref)

    # Multi-chunk grid path: weights are DMA'd once and reused across grid steps.
    B2 = 16
    imgs2 = jax.random.normal(ks[11], (B2, C, H, W), jnp.float32)
    tarb2 = jax.random.normal(ks[12], (B2, D_TAB), jnp.float32)
    out2 = jax.block_until_ready(multimodal_forward(imgs2, tarb2, kernel_params))
    ref2 = multimodal_reference(imgs2, tarb2, params)
    assert out2.shape == (B2, 1), out2.shape
    assert jnp.allclose(out2, ref2, atol=2e-2, rtol=2e-2), (out2, ref2)

    print("KERNEL_OK")
</pallas_src>

<mosaic_0001>
module attributes {stable_mosaic.version = 11 : i64} {
  func.func @_fused_kernel(%arg0: i32, %arg1: memref<4x2048xbf16, #tpu.memory_space<vmem>>, %arg2: memref<8x2048xbf16, #tpu.memory_space<vmem>>, %arg3: memref<64x4xbf16, #tpu.memory_space<vmem>>, %arg4: memref<64x512xbf16, #tpu.memory_space<vmem>>, %arg5: memref<1x512xf32, #tpu.memory_space<vmem>>, %arg6: memref<8x8xf32, #tpu.memory_space<vmem>>, %arg7: memref<8x512xbf16, #tpu.memory_space<vmem>>, %arg8: memref<1x512xf32, #tpu.memory_space<vmem>>, %arg9: memref<2x512x512xbf16, #tpu.memory_space<vmem>>, %arg10: memref<1x512xf32, #tpu.memory_space<vmem>>, %arg11: memref<1x512xbf16, #tpu.memory_space<vmem>>, %arg12: memref<1xf32, #tpu.memory_space<smem>>, %arg13: memref<1x1x8xf32, #tpu.memory_space<vmem>>) attributes {dimension_semantics = [#tpu.dimension_semantics<parallel>], iteration_bounds = array<i64: 1>, scalar_prefetch = 0 : i64, scratch_operands = 0 : i64, tpu.core_type = #tpu.core_type<tc>, window_params = [{transform_indices = @transform_0, window_bounds = array<i64: 4, 2048>}, {pipeline_mode = #tpu.pipeline_mode<synchronous>, transform_indices = @transform_1, window_bounds = array<i64: 8, 2048>}, {pipeline_mode = #tpu.pipeline_mode<synchronous>, transform_indices = @transform_2, window_bounds = array<i64: 64, 4>}, {pipeline_mode = #tpu.pipeline_mode<synchronous>, transform_indices = @transform_3, window_bounds = array<i64: 64, 512>}, {pipeline_mode = #tpu.pipeline_mode<synchronous>, transform_indices = @transform_4, window_bounds = array<i64: 1, 512>}, {transform_indices = @transform_5, window_bounds = array<i64: 8, 8>}, {pipeline_mode = #tpu.pipeline_mode<synchronous>, transform_indices = @transform_6, window_bounds = array<i64: 8, 512>}, {pipeline_mode = #tpu.pipeline_mode<synchronous>, transform_indices = @transform_7, window_bounds = array<i64: 1, 512>}, {pipeline_mode = #tpu.pipeline_mode<synchronous>, transform_indices = @transform_8, window_bounds = array<i64: 2, 512, 512>}, {pipeline_mode = #tpu.pipeline_mode<synchronous>, transform_indices = @transform_9, window_bounds = array<i64: 1, 512>}, {pipeline_mode = #tpu.pipeline_mode<synchronous>, transform_indices = @transform_10, window_bounds = array<i64: 1, 512>}, {transform_indices = @transform_11, window_bounds = array<i64: 1>}, {transform_indices = @transform_12, window_bounds = array<i64: 1, 1, 8>}]} {
    %c0 = arith.constant 0 : index
    %c0_0 = arith.constant 0 : index
    %0 = vector.load %arg3[%c0, %c0_0] : memref<64x4xbf16, #tpu.memory_space<vmem>>, vector<64x4xbf16>
    %c0_1 = arith.constant 0 : index
    %c0_2 = arith.constant 0 : index
    %1 = vector.load %arg1[%c0_1, %c0_2] : memref<4x2048xbf16, #tpu.memory_space<vmem>>, vector<4x2048xbf16>
    %cst = arith.constant dense<0.000000e+00> : vector<64x2048xf32>
    %2 = tpu.matmul %0, %1, %cst {dimension_numbers = #tpu.dot_dimension_numbers<[1], [0], [0], [1], [0, 0, 1, 1], [], []>} : vector<64x4xbf16>, vector<4x2048xbf16>, vector<64x2048xf32> -> vector<64x2048xf32>
    %cst_3 = arith.constant 0.000000e+00 : f32
    %3 = vector.broadcast %cst_3 : f32 to vector<64x2048xf32>
    %4 = arith.maximumf %2, %3 : vector<64x2048xf32>
    %c0_4 = arith.constant 0 : index
    %c0_5 = arith.constant 0 : index
    %5 = vector.load %arg2[%c0_4, %c0_5] : memref<8x2048xbf16, #tpu.memory_space<vmem>>, vector<8x2048xbf16>
    %6 = arith.truncf %4 : vector<64x2048xf32> to vector<64x2048xbf16>
    %cst_6 = arith.constant dense<0.000000e+00> : vector<8x64xf32>
    %7 = tpu.matmul %5, %6, %cst_6 {dimension_numbers = #tpu.dot_dimension_numbers<[1], [1], [0], [0], [0, 0, 1, 0], [], []>} : vector<8x2048xbf16>, vector<64x2048xbf16>, vector<8x64xf32> -> vector<8x64xf32>
    %8 = arith.truncf %7 : vector<8x64xf32> to vector<8x64xbf16>
    %c0_7 = arith.constant 0 : index
    %c0_8 = arith.constant 0 : index
    %9 = vector.load %arg4[%c0_7, %c0_8] : memref<64x512xbf16, #tpu.memory_space<vmem>>, vector<64x512xbf16>
    %cst_9 = arith.constant dense<0.000000e+00> : vector<8x512xf32>
    %10 = tpu.matmul %8, %9, %cst_9 {dimension_numbers = #tpu.dot_dimension_numbers<[1], [0], [0], [1], [0, 0, 1, 1], [], []>} : vector<8x64xbf16>, vector<64x512xbf16>, vector<8x512xf32> -> vector<8x512xf32>
    %c0_10 = arith.constant 0 : index
    %c0_11 = arith.constant 0 : index
    %11 = vector.load %arg5[%c0_10, %c0_11] : memref<1x512xf32, #tpu.memory_space<vmem>>, vector<1x512xf32>
    %12 = vector.broadcast %11 : vector<1x512xf32> to vector<8x512xf32>
    %13 = arith.addf %10, %12 : vector<8x512xf32>
    %cst_12 = arith.constant 0.000000e+00 : f32
    %14 = vector.broadcast %cst_12 : f32 to vector<8x512xf32>
    %15 = arith.maximumf %13, %14 : vector<8x512xf32>
    %c0_13 = arith.constant 0 : index
    %c0_14 = arith.constant 0 : index
    %16 = vector.load %arg6[%c0_13, %c0_14] : memref<8x8xf32, #tpu.memory_space<vmem>>, vector<8x8xf32>
    %17 = arith.truncf %16 : vector<8x8xf32> to vector<8x8xbf16>
    %c0_15 = arith.constant 0 : index
    %c0_16 = arith.constant 0 : index
    %18 = vector.load %arg7[%c0_15, %c0_16] : memref<8x512xbf16, #tpu.memory_space<vmem>>, vector<8x512xbf16>
    %cst_17 = arith.constant dense<0.000000e+00> : vector<8x512xf32>
    %19 = tpu.matmul %17, %18, %cst_17 {dimension_numbers = #tpu.dot_dimension_numbers<[1], [0], [0], [1], [0, 0, 1, 1], [], []>} : vector<8x8xbf16>, vector<8x512xbf16>, vector<8x512xf32> -> vector<8x512xf32>
    %c0_18 = arith.constant 0 : index
    %c0_19 = arith.constant 0 : index
    %20 = vector.load %arg8[%c0_18, %c0_19] : memref<1x512xf32, #tpu.memory_space<vmem>>, vector<1x512xf32>
    %21 = vector.broadcast %20 : vector<1x512xf32> to vector<8x512xf32>
    %22 = arith.addf %19, %21 : vector<8x512xf32>
    %cst_20 = arith.constant 0.000000e+00 : f32
    %23 = vector.broadcast %cst_20 : f32 to vector<8x512xf32>
    %24 = arith.maximumf %22, %23 : vector<8x512xf32>
    %25 = arith.truncf %15 : vector<8x512xf32> to vector<8x512xbf16>
    %c0_21 = arith.constant 0 : index
    %c0_22 = arith.constant 0 : index
    %c0_23 = arith.constant 0 : index
    %26 = vector.load %arg9[%c0_21, %c0_22, %c0_23] : memref<2x512x512xbf16, #tpu.memory_space<vmem>>, vector<1x512x512xbf16>
    %27 = vector.shape_cast %26 : vector<1x512x512xbf16> to vector<512x512xbf16>
    %cst_24 = arith.constant dense<0.000000e+00> : vector<8x512xf32>
    %28 = tpu.matmul %25, %27, %cst_24 {dimension_numbers = #tpu.dot_dimension_numbers<[1], [0], [0], [1], [0, 0, 1, 1], [], []>} : vector<8x512xbf16>, vector<512x512xbf16>, vector<8x512xf32> -> vector<8x512xf32>
    %29 = arith.truncf %24 : vector<8x512xf32> to vector<8x512xbf16>
    %c1 = arith.constant 1 : index
    %c0_25 = arith.constant 0 : index
    %c0_26 = arith.constant 0 : index
    %30 = vector.load %arg9[%c1, %c0_25, %c0_26] : memref<2x512x512xbf16, #tpu.memory_space<vmem>>, vector<1x512x512xbf16>
    %31 = vector.shape_cast %30 : vector<1x512x512xbf16> to vector<512x512xbf16>
    %cst_27 = arith.constant dense<0.000000e+00> : vector<8x512xf32>
    %32 = tpu.matmul %29, %31, %cst_27 {dimension_numbers = #tpu.dot_dimension_numbers<[1], [0], [0], [1], [0, 0, 1, 1], [], []>} : vector<8x512xbf16>, vector<512x512xbf16>, vector<8x512xf32> -> vector<8x512xf32>
    %33 = arith.addf %28, %32 : vector<8x512xf32>
    %c0_28 = arith.constant 0 : index
    %c0_29 = arith.constant 0 : index
    %34 = vector.load %arg10[%c0_28, %c0_29] : memref<1x512xf32, #tpu.memory_space<vmem>>, vector<1x512xf32>
    %35 = vector.broadcast %34 : vector<1x512xf32> to vector<8x512xf32>
    %36 = arith.addf %33, %35 : vector<8x512xf32>
    %cst_30 = arith.constant 0.000000e+00 : f32
    %37 = vector.broadcast %cst_30 : f32 to vector<8x512xf32>
    %38 = arith.maximumf %36, %37 : vector<8x512xf32>
    %c0_31 = arith.constant 0 : index
    %c0_32 = arith.constant 0 : index
    %39 = vector.load %arg11[%c0_31, %c0_32] : memref<1x512xbf16, #tpu.memory_space<vmem>>, vector<1x512xbf16>
    %40 = arith.truncf %38 : vector<8x512xf32> to vector<8x512xbf16>
    %cst_33 = arith.constant dense<0.000000e+00> : vector<1x8xf32>
    %41 = tpu.matmul %39, %40, %cst_33 {dimension_numbers = #tpu.dot_dimension_numbers<[1], [1], [0], [0], [0, 0, 1, 0], [], []>} : vector<1x512xbf16>, vector<8x512xbf16>, vector<1x8xf32> -> vector<1x8xf32>
    %c0_34 = arith.constant 0 : index
    %42 = memref.load %arg12[%c0_34] : memref<1xf32, #tpu.memory_space<smem>>
    %43 = vector.broadcast %42 : f32 to vector<1x8xf32>
    %44 = arith.addf %41, %43 : vector<1x8xf32>
    %45 = vector.shape_cast %44 : vector<1x8xf32> to vector<1x1x8xf32>
    %c0_35 = arith.constant 0 : index
    %c0_36 = arith.constant 0 : index
    %c0_37 = arith.constant 0 : index
    %46 = vector.load %arg13[%c0_35, %c0_36, %c0_37] : memref<1x1x8xf32, #tpu.memory_space<vmem>>, vector<1x1x8xf32>
    tpu.vector_store %arg13[%c0_35, %c0_36, %c0_37], %45 {strides = array<i32>} : memref<1x1x8xf32, #tpu.memory_space<vmem>>, vector<1x1x8xf32>,
    return
  }
  func.func @transform_0(%arg0: i32) -> (i32, i32) {
    %c0_i32 = arith.constant 0 : i32
    %c0_i32_0 = arith.constant 0 : i32
    return %c0_i32, %arg0 : i32, i32
  }
  func.func @transform_1(%arg0: i32) -> (i32, i32) {
    %c0_i32 = arith.constant 0 : i32
    %c0_i32_0 = arith.constant 0 : i32
    %c0_i32_1 = arith.constant 0 : i32
    return %c0_i32, %c0_i32_0 : i32, i32
  }
  func.func @transform_2(%arg0: i32) -> (i32, i32) {
    %c0_i32 = arith.constant 0 : i32
    %c0_i32_0 = arith.constant 0 : i32
    %c0_i32_1 = arith.constant 0 : i32
    return %c0_i32, %c0_i32_0 : i32, i32
  }
  func.func @transform_3(%arg0: i32) -> (i32, i32) {
    %c0_i32 = arith.constant 0 : i32
    %c0_i32_0 = arith.constant 0 : i32
    %c0_i32_1 = arith.constant 0 : i32
    return %c0_i32, %c0_i32_0 : i32, i32
  }
  func.func @transform_4(%arg0: i32) -> (i32, i32) {
    %c0_i32 = arith.constant 0 : i32
    %c0_i32_0 = arith.constant 0 : i32
    %c0_i32_1 = arith.constant 0 : i32
    return %c0_i32, %c0_i32_0 : i32, i32
  }
  func.func @transform_5(%arg0: i32) -> (i32, i32) {
    %c0_i32 = arith.constant 0 : i32
    %c0_i32_0 = arith.constant 0 : i32
    return %arg0, %c0_i32 : i32, i32
  }
  func.func @transform_6(%arg0: i32) -> (i32, i32) {
    %c0_i32 = arith.constant 0 : i32
    %c0_i32_0 = arith.constant 0 : i32
    %c0_i32_1 = arith.constant 0 : i32
    return %c0_i32, %c0_i32_0 : i32, i32
  }
  func.func @transform_7(%arg0: i32) -> (i32, i32) {
    %c0_i32 = arith.constant 0 : i32
    %c0_i32_0 = arith.constant 0 : i32
    %c0_i32_1 = arith.constant 0 : i32
    return %c0_i32, %c0_i32_0 : i32, i32
  }
  func.func @transform_8(%arg0: i32) -> (i32, i32, i32) {
    %c0_i32 = arith.constant 0 : i32
    %c0_i32_0 = arith.constant 0 : i32
    %c0_i32_1 = arith.constant 0 : i32
    %c0_i32_2 = arith.constant 0 : i32
    return %c0_i32, %c0_i32_0, %c0_i32_1 : i32, i32, i32
  }
  func.func @transform_9(%arg0: i32) -> (i32, i32) {
    %c0_i32 = arith.constant 0 : i32
    %c0_i32_0 = arith.constant 0 : i32
    %c0_i32_1 = arith.constant 0 : i32
    return %c0_i32, %c0_i32_0 : i32, i32
  }
  func.func @transform_10(%arg0: i32) -> (i32, i32) {
    %c0_i32 = arith.constant 0 : i32
    %c0_i32_0 = arith.constant 0 : i32
    %c0_i32_1 = arith.constant 0 : i32
    return %c0_i32, %c0_i32_0 : i32, i32
  }
  func.func @transform_11(%arg0: i32) -> i32 {
    %c0_i32 = arith.constant 0 : i32
    %c0_i32_0 = arith.constant 0 : i32
    return %c0_i32 : i32
  }
  func.func @transform_12(%arg0: i32) -> (i32, i32, i32) {
    %c0_i32 = arith.constant 0 : i32
    %c0_i32_0 = arith.constant 0 : i32
    %c0_i32_1 = arith.constant 0 : i32
    return %arg0, %c0_i32, %c0_i32_0 : i32, i32, i32
  }
}

</mosaic_0001>

<bundles_post_ra>
// kernel: multimodal_forward.1
= control target key start
LH: loop header
LB: loop body
LE: loop exit
PB: predicated region body
PF: predicated region fallthrough
CT: control target
= control target key end

     0   :  { %18 = vsyncpa [#allocation4], 0  ;;  %s4596_s21 = smov [#allocation3]   ;;  %s5119_s0 = inlined_call_operand.vmem [shape: bf16[4,2048], index: 0, kind: input, shape index: {}]   ;;  %s5120_s1 = inlined_call_operand.vmem [shape: bf16[8,2048], index: 1, kind: input, shape index: {}]   ;;  %s5121_s2 = inlined_call_operand.vmem [shape: bf16[64,4], index: 2, kind: input, shape index: {}]   ;;  %s5122_s3 = inlined_call_operand.vmem [shape: bf16[64,512], index: 3, kind: input, shape index: {}]   ;;  %s5123_s4 = inlined_call_operand.vmem [shape: f32[1,512], index: 4, kind: input, shape index: {}]   ;;  %s5124_s5 = inlined_call_operand.vmem [shape: f32[8,8], index: 5, kind: input, shape index: {}]   ;;  %s5125_s6 = inlined_call_operand.vmem [shape: bf16[8,512], index: 6, kind: input, shape index: {}]   ;;  %s5126_s7 = inlined_call_operand.vmem [shape: f32[1,512], index: 7, kind: input, shape index: {}]   ;;  %s5127_s8 = inlined_call_operand.hbm [shape: bf16[2,512,512], index: 8, kind: input, shape index: {}]   ;;  %s5128_s9 = inlined_call_operand.vmem [shape: f32[1,512], index: 9, kind: input, shape index: {}]   ;;  %s5129_s10 = inlined_call_operand.vmem [shape: bf16[1,512], index: 10, kind: input, shape index: {}]   ;;  %s5130_s11 = inlined_call_operand.<no memory space> [shape: f32[1], index: 11, kind: input, shape index: {}]   ;;  %s5131_s12 = inlined_call_operand.vmem [shape: f32[1,1,8], index: 12, kind: output, shape index: {}]  }
   0x1   :  { %s40_s22 = sshll.u32 %s4596_s21, 4  ;;  %s4572_s25 = scalar_lea.hbm %s5127_s8, 32768  ;;  %s41_s22 = int_to_ptr.vmem [resolvable:$true] %s40_s22 }
   0x2   :  { %p4573_p0 = scmp.ne.s32.totalorder %s5127_s8, %s4572_s25  ;;  %p4576_p1 = scmp.lt.u32.totalorder %s4572_s25, %s5127_s8 }
   0x4   :  { %p4578_p2 = pnand %p4576_p1, %p4573_p0 }
   0x6   :  { %4581 = shalt.err (!%p4578_p2)
}
   0x7   :  { %s4582_s30 = scalar_lea.vmem %s41_s22, 32768  ;;  %p4587_p4 = scmp.lt.s32.totalorder %s41_s22, %s41_s22 }
   0x8   :  { %p4583_p3 = scmp.ne.s32.totalorder %s41_s22, %s4582_s30  ;;  %p4588_p5 = scmp.lt.s32.totalorder %s4582_s30, %s4582_s30 }
   0xa   :  { %p4589_p6 = por %p4588_p5, %p4587_p4 }
   0xc   :  { %p4590_p7 = pnand %p4589_p6, %p4583_p3 }
   0xe   :  { %4593 = shalt.err (!%p4590_p7)
}
   0xf   :  { %s4597_s13 = smov 256   ;;  %s4598_s14 = smov 16  }
  0x10   :  { %46 = dma.hbm_to_vmem [thread:$0]  %s5127_s8, 32768, %s41_s22, [#allocation4], %s4597_s13, %s4597_s13, %s4598_s14  }
  0x11   :  { %4594 = dma.done.wait [#allocation4], 32768  }
  0x12   :  { %4595 = vsyncadd [#allocation4], 4294934528  ;;  %v97_v0 = vlaneseq  ;;  %v4599_v1 = vmov 1983009808   ;;  %v4600_v3 = vmov 0   ;;  %v65_v7 = vld [vmem:[%s5119_s0] sm:$0xff] }
  0x13   :  { %v95_v2 = vunpack.c.l.s4 %v4599_v1  ;;  %255 = vmatprep.mubr.bf16.mxu0 %v4600_v3  ;;  %328 = vmatprep.mubr.bf16.mxu1 %v4600_v3  ;;  %vm174_vm0 = vcmask 1041408   ;;  %v93_v9 = vcombine.high %v65_v7, %v65_v7  ;;  %v66_v10 = vld [vmem:[%s5119_s0 + $0x8] sm:$0xff]  ;;  %v67_v18 = vld [vmem:[%s5119_s0 + $0x10] sm:$0xff]  ;;  %v4699_v21 = vld [vmem:[%s5121_s2] sm:$0xff]   ;;  %vm161_vm1 = vcmask 31744  }
  0x14   :  { %v4681_v4 = vshrl.u32 %v97_v0, 7  ;;  %v110_v12 = vcombine.high %v66_v10, %v66_v10  ;;  %v127_v23 = vcombine.high %v67_v18, %v67_v18  ;;  %v4714_v30 = vld [vmem:[%s5121_s2 + $0x8] sm:$0xff]   ;;  %v4727_v31 = vld [vmem:[%s5121_s2 + $0x10] sm:$0xff]   ;;  %v4738_v32 = vld [vmem:[%s5121_s2 + $0x18] sm:$0xff]   ;;  %vm1502_vm2 = vcmask 523264  }
  0x15   :  { %v96_v5 = vunpack.c.0.s8 %v95_v2  ;;  %v68_v33 = vld [vmem:[%s5119_s0 + $0x18] sm:$0xff]  ;;  %v4829_v43 = vld [vmem:[%s5120_s1 + $0x8] sm:$0xff]  ;;  %vm1632_vm3 = vcmask 1043456   ;;  %vm1628_vm4 = vcmask 64512   ;;  %vm3750_vm5 = vcmask 57344  }
  0x16   :  { %v144_v34 = vcombine.high %v68_v33, %v68_v33  ;;  %v3804_v44 = vcombine.high %v4829_v43, %v4829_v43 }
  0x17   :  { %v99_v6 = vsub.s32 %v96_v5, %v4681_v4 }
  0x19   :  { %v100_v8 = vrot.slane %v65_v7, %v99_v6  ;;  %v117_v11 = vrot.slane %v66_v10, %v99_v6  ;;  %v107_v15 = vrot.slane %v93_v9, %v99_v6  ;;  %v124_v17 = vrot.slane %v110_v12, %v99_v6 }
  0x1a   :  { %v134_v22 = vrot.slane %v67_v18, %v99_v6  ;;  %v141_v27 = vrot.slane %v127_v23, %v99_v6  ;;  %v151_v35 = vrot.slane %v68_v33, %v99_v6  ;;  %v158_v36 = vrot.slane %v144_v34, %v99_v6 }
  0x1b   :  { %v108_v13 = vcombine.high %v100_v8, %v100_v8  ;;  %v176_v14 = vsel %vm174_vm0, %v100_v8, 0  ;;  %v125_v16 = vcombine.high %v117_v11, %v117_v11  ;;  %v109_v19 = vcombine.high %v107_v15, %v107_v15 }
  0x1c   :  { %v182_v20 = vsel %vm174_vm0, %v107_v15, 0  ;;  %v126_v24 = vcombine.high %v124_v17, %v124_v17  ;;  %v188_v25 = vsel %vm174_vm0, %v117_v11, 0  ;;  %v142_v26 = vcombine.high %v134_v22, %v134_v22 }
  0x1d   :  { %3761 = vmatprep.subr.msk.bf16.mxu0 %vm174_vm0, %v108_v13  ;;  %3766 = vmatprep.subr.msk.bf16.mxu1 %vm174_vm0, %v109_v19  ;;  %v194_v28 = vsel %vm174_vm0, %v124_v17, 0  ;;  %v143_v29 = vcombine.high %v141_v27, %v141_v27  ;;  %v200_v37 = vsel %vm174_vm0, %v134_v22, 0  ;;  %v159_v38 = vcombine.high %v151_v35, %v151_v35 }
  0x1e   :  { %224 = vmatpush1.bf16.msra.mxu0 %v176_v14  ;;  %297 = vmatpush1.bf16.msra.mxu1 %v182_v20  ;;  %v206_v39 = vsel %vm174_vm0, %v141_v27, 0  ;;  %v160_v40 = vcombine.high %v158_v36, %v158_v36  ;;  %v212_v41 = vsel %vm174_vm0, %v151_v35, 0  ;;  %v218_v42 = vsel %vm174_vm0, %v158_v36, 0 }
  0x1f   :  { %3771 = vmatprep.subr.msk.bf16.mxu0 %vm174_vm0, %v125_v16  ;;  %3776 = vmatprep.subr.msk.bf16.mxu1 %vm174_vm0, %v126_v24 }
  0x21   :  { %3762 = vmatmul.mubr.msk.bf16.vlgmr.msra.gmra.mrb[0].mxu0 %vm161_vm1, %v4699_v21  ;;  %3767 = vmatmul.mubr.msk.bf16.vlgmr.msra.gmra.mrb[0].mxu1 %vm161_vm1, %v4699_v21 }
  0x22   :  { %265 = vmatprep.mubr.bf16.mxu0 %v4600_v3  ;;  %370 = vmatpush1.bf16.msra.mxu0 %v188_v25 }
  0x23   :  { %3781 = vmatprep.subr.msk.bf16.mxu0 %vm174_vm0, %v142_v26  ;;  %338 = vmatprep.mubr.bf16.mxu1 %v4600_v3 }
  0x24   :  { %443 = vmatpush1.bf16.msra.mxu1 %v194_v28 }
  0x25   :  { %3786 = vmatprep.subr.msk.bf16.mxu1 %vm174_vm0, %v143_v29 }
  0x29   :  { %3763 = vmatmul.mubr.msk.bf16.gmra.mrb[4].mxu0 %vm161_vm1, %v4714_v30  ;;  %3768 = vmatmul.mubr.msk.bf16.gmra.mrb[4].mxu1 %vm161_vm1, %v4714_v30 }
  0x2a   :  { %275 = vmatprep.mubr.bf16.mxu0 %v4600_v3  ;;  %348 = vmatprep.mubr.bf16.mxu1 %v4600_v3 }
  0x31   :  { %3764 = vmatmul.mubr.msk.bf16.gmra.mrb[8].mxu0 %vm161_vm1, %v4727_v31  ;;  %3769 = vmatmul.mubr.msk.bf16.gmra.mrb[8].mxu1 %vm161_vm1, %v4727_v31 }
  0x32   :  { %285 = vmatprep.mubr.bf16.mxu0 %v4600_v3  ;;  %358 = vmatprep.mubr.bf16.mxu1 %v4600_v3 }
  0x39   :  { %3765 = vmatmul.mubr.msk.bf16.gmra.mrb[12].mxu0 %vm161_vm1, %v4738_v32  ;;  %3770 = vmatmul.mubr.msk.bf16.gmra.mrb[12].mxu1 %vm161_vm1, %v4738_v32 }
  0x3a   :  { %401 = vmatprep.mubr.bf16.mxu0 %v4600_v3  ;;  %474 = vmatprep.mubr.bf16.mxu1 %v4600_v3 }
  0x41   :  { %3772 = vmatmul.mubr.msk.bf16.vlgmr.msra.gmra.mrb[16].mxu0 %vm161_vm1, %v4699_v21  ;;  %3777 = vmatmul.mubr.msk.bf16.vlgmr.msra.gmra.mrb[16].mxu1 %vm161_vm1, %v4699_v21 }
  0x42   :  { %411 = vmatprep.mubr.bf16.mxu0 %v4600_v3  ;;  %516 = vmatpush1.bf16.msra.mxu0 %v200_v37 }
  0x43   :  { %3791 = vmatprep.subr.msk.bf16.mxu0 %vm174_vm0, %v159_v38  ;;  %484 = vmatprep.mubr.bf16.mxu1 %v4600_v3 }
  0x44   :  { %589 = vmatpush1.bf16.msra.mxu1 %v206_v39 }
  0x45   :  { %3796 = vmatprep.subr.msk.bf16.mxu1 %vm174_vm0, %v160_v40 }
  0x49   :  { %3773 = vmatmul.mubr.msk.bf16.gmra.mrb[20].mxu0 %vm161_vm1, %v4714_v30  ;;  %3778 = vmatmul.mubr.msk.bf16.gmra.mrb[20].mxu1 %vm161_vm1, %v4714_v30 }
  0x4a   :  { %421 = vmatprep.mubr.bf16.mxu0 %v4600_v3  ;;  %494 = vmatprep.mubr.bf16.mxu1 %v4600_v3 }
  0x51   :  { %3774 = vmatmul.mubr.msk.bf16.gmra.mrb[24].mxu0 %vm161_vm1, %v4727_v31  ;;  %3779 = vmatmul.mubr.msk.bf16.gmra.mrb[24].mxu1 %vm161_vm1, %v4727_v31 }
  0x52   :  { %431 = vmatprep.mubr.bf16.mxu0 %v4600_v3  ;;  %504 = vmatprep.mubr.bf16.mxu1 %v4600_v3 }
  0x59   :  { %3775 = vmatmul.mubr.msk.bf16.gmra.mrb[28].mxu0 %vm161_vm1, %v4738_v32  ;;  %3780 = vmatmul.mubr.msk.bf16.gmra.mrb[28].mxu1 %vm161_vm1, %v4738_v32 }
  0x5a   :  { %547 = vmatprep.mubr.bf16.mxu0 %v4600_v3  ;;  %620 = vmatprep.mubr.bf16.mxu1 %v4600_v3 }
  0x61   :  { %3782 = vmatmul.mubr.msk.bf16.vlgmr.msra.gmra.mrb[32].mxu0 %vm161_vm1, %v4699_v21  ;;  %3787 = vmatmul.mubr.msk.bf16.vlgmr.msra.gmra.mrb[32].mxu1 %vm161_vm1, %v4699_v21 }
  0x62   :  { %557 = vmatprep.mubr.bf16.mxu0 %v4600_v3  ;;  %662 = vmatpush1.bf16.msra.mxu0 %v212_v41 }
  0x63   :  { %630 = vmatprep.mubr.bf16.mxu1 %v4600_v3  ;;  %735 = vmatpush1.bf16.msra.mxu1 %v218_v42 }
  0x69   :  { %3783 = vmatmul.mubr.msk.bf16.gmra.mrb[36].mxu0 %vm161_vm1, %v4714_v30  ;;  %3788 = vmatmul.mubr.msk.bf16.gmra.mrb[36].mxu1 %vm161_vm1, %v4714_v30 }
  0x6a   :  { %567 = vmatprep.mubr.bf16.mxu0 %v4600_v3  ;;  %640 = vmatprep.mubr.bf16.mxu1 %v4600_v3 }
  0x71   :  { %3784 = vmatmul.mubr.msk.bf16.gmra.mrb[40].mxu0 %vm161_vm1, %v4727_v31  ;;  %3789 = vmatmul.mubr.msk.bf16.gmra.mrb[40].mxu1 %vm161_vm1, %v4727_v31 }
  0x72   :  { %577 = vmatprep.mubr.bf16.mxu0 %v4600_v3  ;;  %650 = vmatprep.mubr.bf16.mxu1 %v4600_v3 }
  0x79   :  { %3785 = vmatmul.mubr.msk.bf16.gmra.mrb[44].mxu0 %vm161_vm1, %v4738_v32  ;;  %3790 = vmatmul.mubr.msk.bf16.gmra.mrb[44].mxu1 %vm161_vm1, %v4738_v32 }
  0x7a   :  { %693 = vmatprep.mubr.bf16.mxu0 %v4600_v3  ;;  %766 = vmatprep.mubr.bf16.mxu1 %v4600_v3 }
  0x81   :  { %3792 = vmatmul.mubr.msk.bf16.vlgmr.msra.gmra.mrb[48].mxu0 %vm161_vm1, %v4699_v21  ;;  %3797 = vmatmul.mubr.msk.bf16.vlgmr.msra.gmra.mrb[48].mxu1 %vm161_vm1, %v4699_v21 }
  0x82   :  { %703 = vmatprep.mubr.bf16.mxu0 %v4600_v3  ;;  %776 = vmatprep.mubr.bf16.mxu1 %v4600_v3 }
  0x89   :  { %3793 = vmatmul.mubr.msk.bf16.gmra.mrb[52].mxu0 %vm161_vm1, %v4714_v30  ;;  %3798 = vmatmul.mubr.msk.bf16.gmra.mrb[52].mxu1 %vm161_vm1, %v4714_v30 }
  0x8a   :  { %713 = vmatprep.mubr.bf16.mxu0 %v4600_v3  ;;  %786 = vmatprep.mubr.bf16.mxu1 %v4600_v3 }
  0x91   :  { %3794 = vmatmul.mubr.msk.bf16.gmra.mrb[56].mxu0 %vm161_vm1, %v4727_v31  ;;  %3799 = vmatmul.mubr.msk.bf16.gmra.mrb[56].mxu1 %vm161_vm1, %v4727_v31 }
  0x92   :  { %723 = vmatprep.mubr.bf16.mxu0 %v4600_v3  ;;  %796 = vmatprep.mubr.bf16.mxu1 %v4600_v3 }
  0x99   :  { %3795 = vmatmul.mubr.msk.bf16.gmra.mrb[60].mxu0 %vm161_vm1, %v4738_v32  ;;  %3800 = vmatmul.mubr.msk.bf16.gmra.mrb[60].mxu1 %vm161_vm1, %v4738_v32 }
  0x9a   :  { %1135 = vmatprep.mubr.bf16.mxu0 %v3804_v44 }
  0xf4   :  { %v257_v45 = vpop.f32.mrb[0].mxu0  ;;  %v330_v50 = vpop.f32.mrb[0].mxu1 }
  0xf5   :  { %v807_v46 = vmax.f32 %v257_v45, 0.0  ;;  %v259_v47 = vpop.f32.mrb[1].mxu0  ;;  %v332_v53 = vpop.f32.mrb[1].mxu1  ;;  %v809_v57 = vmax.f32 %v330_v50, 0.0 }
  0xf6   :  { %v808_v48 = vmax.f32 %v259_v47, 0.0  ;;  %v261_v49 = vpop.f32.mrb[2].mxu0  ;;  %v334_v55 = vpop.f32.mrb[2].mxu1  ;;  %v810_v61 = vmax.f32 %v332_v53, 0.0 }
  0xf7   :  { %v823_v51 = vmax.f32 %v261_v49, 0.0  ;;  %v263_v52 = vpop.f32.mrb[3].mxu0  ;;  %v825_v58 = vmax.f32 %v334_v55, 0.0  ;;  %v336_v59 = vpop.f32.mrb[3].mxu1 }
  0xf8   :  { %v824_v54 = vmax.f32 %v263_v52, 0.0  ;;  %v826_v62 = vmax.f32 %v336_v59, 0.0 }
  0xf9   :  { %v943_v56 = vpack.c.bf16 %v823_v51, %v807_v46  ;;  %v945_v63 = vpack.c.bf16 %v825_v58, %v809_v57 }
  0xfa   :  { %v944_v60 = vpack.c.bf16 %v824_v54, %v808_v48  ;;  %v946_v0 = vpack.c.bf16 %v826_v62, %v810_v61 }
  0xfc   :  { %v267_v1 = vpop.f32.mrb[4].mxu0  ;;  %1063 = vmatprep.subr.bf16.mxu1 %v944_v60  ;;  %v340_v8 = vpop.f32.mrb[4].mxu1  ;;  %1103 = vmatprep.subr.bf16.mxu0 %v946_v0 }
  0xfd   :  { %v839_v2 = vmax.f32 %v267_v1, 0.0  ;;  %v269_v5 = vpop.f32.mrb[5].mxu0  ;;  %1064 = vmatpush1.bf16.xpose.msra.mxu1 %v943_v56  ;;  %v342_v11 = vpop.f32.mrb[5].mxu1  ;;  %1104 = vmatpush1.bf16.xpose.msra.mxu0 %v945_v63  ;;  %v841_v15 = vmax.f32 %v340_v8, 0.0 }
  0xfe   :  { %v840_v6 = vmax.f32 %v269_v5, 0.0  ;;  %v271_v7 = vpop.f32.mrb[6].mxu0  ;;  %v344_v13 = vpop.f32.mrb[6].mxu1  ;;  %v842_v19 = vmax.f32 %v342_v11, 0.0 }
  0xff   :  { %v855_v9 = vmax.f32 %v271_v7, 0.0  ;;  %v273_v10 = vpop.f32.mrb[7].mxu0  ;;  %v857_v16 = vmax.f32 %v344_v13, 0.0  ;;  %v346_v17 = vpop.f32.mrb[7].mxu1 }
 0x100   :  { %v856_v12 = vmax.f32 %v273_v10, 0.0  ;;  %v858_v20 = vmax.f32 %v346_v17, 0.0 }
 0x101   :  { %v959_v14 = vpack.c.bf16 %v855_v9, %v839_v2  ;;  %v961_v21 = vpack.c.bf16 %v857_v16, %v841_v15  ;;  %v4836_v15 = vld [vmem:[%s5120_s1 + $0x10] sm:$0xff] }
 0x102   :  { %v960_v18 = vpack.c.bf16 %v856_v12, %v840_v6  ;;  %v962_v22 = vpack.c.bf16 %v858_v20, %v842_v19  ;;  %v3803_v20 = vcombine.low %v4829_v43, %v4829_v43 }
 0x104   :  { %v277_v23 = vpop.f32.mrb[8].mxu0  ;;  %1065 = vmatprep.subr.bf16.mxu1 %v960_v18  ;;  %v350_v28 = vpop.f32.mrb[8].mxu1  ;;  %1105 = vmatprep.subr.bf16.mxu0 %v962_v22 }
 0x105   :  { %v871_v24 = vmax.f32 %v277_v23, 0.0  ;;  %v279_v25 = vpop.f32.mrb[9].mxu0  ;;  %1066 = vmatpush1.bf16.xpose.msra.mxu1 %v959_v14  ;;  %v352_v31 = vpop.f32.mrb[9].mxu1  ;;  %1106 = vmatpush1.bf16.xpose.msra.mxu0 %v961_v21  ;;  %v873_v35 = vmax.f32 %v350_v28, 0.0  ;;  %v3806_v23 = vcombine.high %v4836_v15, %v4836_v15 }
 0x106   :  { %v872_v26 = vmax.f32 %v279_v25, 0.0  ;;  %v281_v27 = vpop.f32.mrb[10].mxu0  ;;  %v354_v33 = vpop.f32.mrb[10].mxu1  ;;  %v874_v39 = vmax.f32 %v352_v31, 0.0 }
 0x107   :  { %v887_v29 = vmax.f32 %v281_v27, 0.0  ;;  %v283_v30 = vpop.f32.mrb[11].mxu0  ;;  %v889_v36 = vmax.f32 %v354_v33, 0.0  ;;  %v356_v37 = vpop.f32.mrb[11].mxu1 }
 0x108   :  { %v888_v32 = vmax.f32 %v283_v30, 0.0  ;;  %v890_v40 = vmax.f32 %v356_v37, 0.0 }
 0x109   :  { %v975_v34 = vpack.c.bf16 %v887_v29, %v871_v24  ;;  %v977_v41 = vpack.c.bf16 %v889_v36, %v873_v35 }
 0x10a   :  { %v976_v38 = vpack.c.bf16 %v888_v32, %v872_v26  ;;  %v978_v42 = vpack.c.bf16 %v890_v40, %v874_v39 }
 0x10c   :  { %v287_v44 = vpop.f32.mrb[12].mxu0  ;;  %1067 = vmatprep.subr.bf16.mxu1 %v976_v38  ;;  %v360_v49 = vpop.f32.mrb[12].mxu1  ;;  %1107 = vmatprep.subr.bf16.mxu0 %v978_v42 }
 0x10d   :  { %v903_v45 = vmax.f32 %v287_v44, 0.0  ;;  %v289_v46 = vpop.f32.mrb[13].mxu0  ;;  %1068 = vmatpush1.bf16.xpose.msra.mxu1 %v975_v34  ;;  %v362_v52 = vpop.f32.mrb[13].mxu1  ;;  %1108 = vmatpush1.bf16.xpose.msra.mxu0 %v977_v41  ;;  %v905_v56 = vmax.f32 %v360_v49, 0.0 }
 0x10e   :  { %v904_v47 = vmax.f32 %v289_v46, 0.0  ;;  %v291_v48 = vpop.f32.mrb[14].mxu0  ;;  %v364_v54 = vpop.f32.mrb[14].mxu1  ;;  %v906_v60 = vmax.f32 %v362_v52, 0.0 }
 0x10f   :  { %v919_v50 = vmax.f32 %v291_v48, 0.0  ;;  %v293_v51 = vpop.f32.mrb[15].mxu0  ;;  %v921_v57 = vmax.f32 %v364_v54, 0.0  ;;  %v366_v58 = vpop.f32.mrb[15].mxu1 }
 0x110   :  { %v920_v53 = vmax.f32 %v293_v51, 0.0  ;;  %v922_v61 = vmax.f32 %v366_v58, 0.0 }
 0x111   :  { %v991_v55 = vpack.c.bf16 %v919_v50, %v903_v45  ;;  %v993_v62 = vpack.c.bf16 %v921_v57, %v905_v56 }
 0x112   :  { %v992_v59 = vpack.c.bf16 %v920_v53, %v904_v47  ;;  %v994_v63 = vpack.c.bf16 %v922_v61, %v906_v60 }
 0x114   :  { %v403_v0 = vpop.f32.mrb[16].mxu0  ;;  %1069 = vmatprep.subr.bf16.mxu1 %v992_v59  ;;  %1109 = vmatprep.subr.bf16.mxu0 %v994_v63  ;;  %v476_v7 = vpop.f32.mrb[16].mxu1 }
 0x115   :  { %v811_v1 = vmax.f32 %v403_v0, 0.0  ;;  %v405_v2 = vpop.f32.mrb[17].mxu0  ;;  %1070 = vmatpush1.bf16.xpose.msra.mxu1 %v991_v55  ;;  %1110 = vmatpush1.bf16.xpose.msra.mxu0 %v993_v62  ;;  %v813_v10 = vmax.f32 %v476_v7, 0.0  ;;  %v478_v11 = vpop.f32.mrb[17].mxu1 }
 0x116   :  { %v812_v5 = vmax.f32 %v405_v2, 0.0  ;;  %v407_v6 = vpop.f32.mrb[18].mxu0  ;;  %v814_v13 = vmax.f32 %v478_v11, 0.0  ;;  %v480_v14 = vpop.f32.mrb[18].mxu1 }
 0x117   :  { %v827_v8 = vmax.f32 %v407_v6, 0.0  ;;  %v409_v9 = vpop.f32.mrb[19].mxu0  ;;  %v829_v17 = vmax.f32 %v480_v14, 0.0  ;;  %v482_v18 = vpop.f32.mrb[19].mxu1 }
 0x118   :  { %v828_v12 = vmax.f32 %v409_v9, 0.0  ;;  %v830_v21 = vmax.f32 %v482_v18, 0.0 }
 0x119   :  { %v947_v16 = vpack.c.bf16 %v827_v8, %v811_v1  ;;  %v4840_v22 = vpack.c.bf16 %v829_v17, %v813_v10 }
 0x11a   :  { %v948_v19 = vpack.c.bf16 %v828_v12, %v812_v5  ;;  %v4844_v25 = vpack.c.bf16 %v830_v21, %v814_v13 }
 0x11c   :  { %v413_v24 = vpop.f32.mrb[20].mxu0  ;;  %1143 = vmatprep.subr.bf16.mxu0 %v948_v19  ;;  %1136 = vmatmul.mubr.bf16.vlgmr.msra.gmra.mrb[64].mxu0 %v3803_v20  ;;  %v486_v30 = vpop.f32.mrb[20].mxu1 }
 0x11d   :  { %v843_v26 = vmax.f32 %v413_v24, 0.0  ;;  %v415_v27 = vpop.f32.mrb[21].mxu0  ;;  %1144 = vmatpush1.bf16.xpose.msra.mxu0 %v947_v16  ;;  %v845_v43 = vmax.f32 %v486_v30, 0.0  ;;  %v488_v33 = vpop.f32.mrb[21].mxu1  ;;  %1175 = vmatprep.mubr.bf16.mxu0 %v3806_v23 }
 0x11e   :  { %v844_v28 = vmax.f32 %v415_v27, 0.0  ;;  %v417_v29 = vpop.f32.mrb[22].mxu0  ;;  %v846_v35 = vmax.f32 %v488_v33, 0.0  ;;  %v490_v36 = vpop.f32.mrb[22].mxu1 }
 0x11f   :  { %v859_v31 = vmax.f32 %v417_v29, 0.0  ;;  %v419_v32 = vpop.f32.mrb[23].mxu0  ;;  %v861_v38 = vmax.f32 %v490_v36, 0.0  ;;  %v492_v39 = vpop.f32.mrb[23].mxu1  ;;  %v4862_v36 = vld [vmem:[%s5120_s1 + $0x18] sm:$0xff] }
 0x120   :  { %v860_v34 = vmax.f32 %v419_v32, 0.0  ;;  %v862_v41 = vmax.f32 %v492_v39, 0.0 }
 0x121   :  { %v963_v37 = vpack.c.bf16 %v859_v31, %v843_v26  ;;  %v4846_v42 = vpack.c.bf16 %v861_v38, %v845_v43 }
 0x122   :  { %v964_v40 = vpack.c.bf16 %v860_v34, %v844_v28  ;;  %v4848_v45 = vpack.c.bf16 %v862_v41, %v846_v35 }
 0x124   :  { %v423_v44 = vpop.f32.mrb[24].mxu0  ;;  %1145 = vmatprep.subr.bf16.mxu0 %v964_v40  ;;  %v496_v50 = vpop.f32.mrb[24].mxu1 }
 0x125   :  { %v875_v46 = vmax.f32 %v423_v44, 0.0  ;;  %v425_v47 = vpop.f32.mrb[25].mxu0  ;;  %1146 = vmatpush1.bf16.xpose.msra.mxu0 %v963_v37  ;;  %v877_v53 = vmax.f32 %v496_v50, 0.0  ;;  %v498_v54 = vpop.f32.mrb[25].mxu1  ;;  %v3805_v44 = vcombine.low %v4836_v15, %v4836_v15 }
 0x126   :  { %v876_v48 = vmax.f32 %v425_v47, 0.0  ;;  %v427_v49 = vpop.f32.mrb[26].mxu0  ;;  %v878_v56 = vmax.f32 %v498_v54, 0.0  ;;  %v500_v57 = vpop.f32.mrb[26].mxu1 }
 0x127   :  { %v891_v51 = vmax.f32 %v427_v49, 0.0  ;;  %v429_v52 = vpop.f32.mrb[27].mxu0  ;;  %v893_v59 = vmax.f32 %v500_v57, 0.0  ;;  %v502_v60 = vpop.f32.mrb[27].mxu1 }
 0x128   :  { %v892_v55 = vmax.f32 %v429_v52, 0.0  ;;  %v894_v62 = vmax.f32 %v502_v60, 0.0 }
 0x129   :  { %v979_v58 = vpack.c.bf16 %v891_v51, %v875_v46  ;;  %v4850_v63 = vpack.c.bf16 %v893_v59, %v877_v53 }
 0x12a   :  { %v980_v61 = vpack.c.bf16 %v892_v55, %v876_v48  ;;  %v4852_v1 = vpack.c.bf16 %v894_v62, %v878_v56 }
 0x12c   :  { %v433_v0 = vpop.f32.mrb[28].mxu0  ;;  %1147 = vmatprep.subr.bf16.mxu0 %v980_v61  ;;  %v506_v8 = vpop.f32.mrb[28].mxu1 }
 0x12d   :  { %v907_v2 = vmax.f32 %v433_v0, 0.0  ;;  %v435_v5 = vpop.f32.mrb[29].mxu0  ;;  %1148 = vmatpush1.bf16.xpose.msra.mxu0 %v979_v58  ;;  %v909_v11 = vmax.f32 %v506_v8, 0.0  ;;  %v508_v12 = vpop.f32.mrb[29].mxu1 }
 0x12e   :  { %v908_v6 = vmax.f32 %v435_v5, 0.0  ;;  %v437_v7 = vpop.f32.mrb[30].mxu0  ;;  %v910_v14 = vmax.f32 %v508_v12, 0.0  ;;  %v510_v16 = vpop.f32.mrb[30].mxu1 }
 0x12f   :  { %v923_v9 = vmax.f32 %v437_v7, 0.0  ;;  %v439_v10 = vpop.f32.mrb[31].mxu0  ;;  %v925_v18 = vmax.f32 %v510_v16, 0.0  ;;  %v512_v19 = vpop.f32.mrb[31].mxu1 }
 0x130   :  { %v924_v13 = vmax.f32 %v439_v10, 0.0  ;;  %v926_v21 = vmax.f32 %v512_v19, 0.0 }
 0x131   :  { %v995_v17 = vpack.c.bf16 %v923_v9, %v907_v2  ;;  %v4854_v23 = vpack.c.bf16 %v925_v18, %v909_v11 }
 0x132   :  { %v996_v20 = vpack.c.bf16 %v924_v13, %v908_v6  ;;  %v4856_v24 = vpack.c.bf16 %v926_v21, %v910_v14 }
 0x134   :  { %1149 = vmatprep.subr.bf16.mxu0 %v996_v20  ;;  %v549_v26 = vpop.f32.mrb[32].mxu0  ;;  %v622_v31 = vpop.f32.mrb[32].mxu1 }
 0x135   :  { %v815_v27 = vmax.f32 %v549_v26, 0.0  ;;  %v551_v28 = vpop.f32.mrb[33].mxu0  ;;  %1150 = vmatpush1.bf16.xpose.msra.mxu0 %v995_v17  ;;  %v817_v33 = vmax.f32 %v622_v31, 0.0  ;;  %v624_v34 = vpop.f32.mrb[33].mxu1 }
 0x136   :  { %v816_v29 = vmax.f32 %v551_v28, 0.0  ;;  %v553_v30 = vpop.f32.mrb[34].mxu0  ;;  %1183 = vmatprep.subr.bf16.mxu0 %v4844_v25  ;;  %v818_v37 = vmax.f32 %v624_v34, 0.0  ;;  %v626_v38 = vpop.f32.mrb[34].mxu1  ;;  %v3808_v25 = vcombine.high %v4862_v36, %v4862_v36 }
 0x137   :  { %v831_v32 = vmax.f32 %v553_v30, 0.0  ;;  %v555_v43 = vpop.f32.mrb[35].mxu0  ;;  %v833_v40 = vmax.f32 %v626_v38, 0.0  ;;  %v628_v41 = vpop.f32.mrb[35].mxu1 }
 0x138   :  { %v832_v35 = vmax.f32 %v555_v43, 0.0  ;;  %v834_v47 = vmax.f32 %v628_v41, 0.0 }
 0x139   :  { %v4864_v39 = vpack.c.bf16 %v831_v32, %v815_v27  ;;  %v4872_v48 = vpack.c.bf16 %v833_v40, %v817_v33 }
 0x13a   :  { %v4868_v46 = vpack.c.bf16 %v832_v35, %v816_v29  ;;  %v4874_v50 = vpack.c.bf16 %v834_v47, %v818_v37 }
 0x13c   :  { %v559_v49 = vpop.f32.mrb[36].mxu0  ;;  %1176 = vmatmul.mubr.bf16.vlgmr.msra.gmra.mrb[64].mxu0 %v3805_v44  ;;  %v632_v55 = vpop.f32.mrb[36].mxu1 }
 0x13d   :  { %v847_v51 = vmax.f32 %v559_v49, 0.0  ;;  %v561_v52 = vpop.f32.mrb[37].mxu0  ;;  %1184 = vmatpush1.bf16.xpose.msra.mxu0 %v4840_v22  ;;  %1215 = vmatprep.mubr.bf16.mxu0 %v3808_v25  ;;  %v849_v57 = vmax.f32 %v632_v55, 0.0  ;;  %v634_v58 = vpop.f32.mrb[37].mxu1 }
 0x13e   :  { %v848_v53 = vmax.f32 %v561_v52, 0.0  ;;  %v563_v54 = vpop.f32.mrb[38].mxu0  ;;  %1185 = vmatprep.subr.bf16.mxu0 %v4848_v45  ;;  %v850_v60 = vmax.f32 %v634_v58, 0.0  ;;  %v636_v61 = vpop.f32.mrb[38].mxu1 }
 0x13f   :  { %v863_v15 = vmax.f32 %v563_v54, 0.0  ;;  %v565_v56 = vpop.f32.mrb[39].mxu0  ;;  %v865_v0 = vmax.f32 %v636_v61, 0.0  ;;  %v638_v2 = vpop.f32.mrb[39].mxu1 }
 0x140   :  { %v864_v59 = vmax.f32 %v565_v56, 0.0  ;;  %v866_v6 = vmax.f32 %v638_v2, 0.0  ;;  %v935_v2 = vld [vmem:[%s5120_s1] sm:$0xff] }
 0x141   :  { %v4878_v62 = vpack.c.bf16 %v863_v15, %v847_v51  ;;  %v4882_v7 = vpack.c.bf16 %v865_v0, %v849_v57 }
 0x142   :  { %v4880_v5 = vpack.c.bf16 %v864_v59, %v848_v53  ;;  %v4884_v8 = vpack.c.bf16 %v866_v6, %v850_v60  ;;  %v4914_v6 = vld [vmem:[%s5120_s1 + $0x20] sm:$0xff] }
 0x144   :  { %v569_v22 = vpop.f32.mrb[40].mxu0  ;;  %v642_v45 = vpop.f32.mrb[40].mxu1 }
 0x145   :  { %v879_v9 = vmax.f32 %v569_v22, 0.0  ;;  %v571_v10 = vpop.f32.mrb[41].mxu0  ;;  %1186 = vmatpush1.bf16.xpose.msra.mxu0 %v4846_v42  ;;  %v881_v16 = vmax.f32 %v642_v45, 0.0  ;;  %v644_v17 = vpop.f32.mrb[41].mxu1 }
 0x146   :  { %v880_v11 = vmax.f32 %v571_v10, 0.0  ;;  %v573_v12 = vpop.f32.mrb[42].mxu0  ;;  %1187 = vmatprep.subr.bf16.mxu0 %v4852_v1  ;;  %v882_v19 = vmax.f32 %v644_v17, 0.0  ;;  %v646_v20 = vpop.f32.mrb[42].mxu1  ;;  %v3810_v17 = vcombine.high %v4914_v6, %v4914_v6 }
 0x147   :  { %v895_v13 = vmax.f32 %v573_v12, 0.0  ;;  %v575_v14 = vpop.f32.mrb[43].mxu0  ;;  %v897_v26 = vmax.f32 %v646_v20, 0.0  ;;  %v648_v27 = vpop.f32.mrb[43].mxu1 }
 0x148   :  { %v896_v18 = vmax.f32 %v575_v14, 0.0  ;;  %v898_v29 = vmax.f32 %v648_v27, 0.0  ;;  %v3807_v14 = vcombine.low %v4862_v36, %v4862_v36 }
 0x149   :  { %v4888_v21 = vpack.c.bf16 %v895_v13, %v879_v9  ;;  %v4892_v30 = vpack.c.bf16 %v897_v26, %v881_v16 }
 0x14a   :  { %v4890_v28 = vpack.c.bf16 %v896_v18, %v880_v11  ;;  %v4894_v42 = vpack.c.bf16 %v898_v29, %v882_v19  ;;  %v3801_v11 = vcombine.low %v935_v2, %v935_v2 }
 0x14c   :  { %v579_v31 = vpop.f32.mrb[44].mxu0  ;;  %v652_v1 = vpop.f32.mrb[44].mxu1 }
 0x14d   :  { %v911_v32 = vmax.f32 %v579_v31, 0.0  ;;  %v581_v43 = vpop.f32.mrb[45].mxu0  ;;  %1188 = vmatpush1.bf16.xpose.msra.mxu0 %v4850_v63  ;;  %v913_v38 = vmax.f32 %v652_v1, 0.0  ;;  %v654_v40 = vpop.f32.mrb[45].mxu1 }
 0x14e   :  { %v912_v33 = vmax.f32 %v581_v43, 0.0  ;;  %v583_v34 = vpop.f32.mrb[46].mxu0  ;;  %1189 = vmatprep.subr.bf16.mxu0 %v4856_v24  ;;  %v914_v44 = vmax.f32 %v654_v40, 0.0  ;;  %v656_v47 = vpop.f32.mrb[46].mxu1 }
 0x14f   :  { %v927_v35 = vmax.f32 %v583_v34, 0.0  ;;  %v585_v37 = vpop.f32.mrb[47].mxu0  ;;  %v929_v49 = vmax.f32 %v656_v47, 0.0  ;;  %v658_v51 = vpop.f32.mrb[47].mxu1 }
 0x150   :  { %v928_v41 = vmax.f32 %v585_v37, 0.0  ;;  %v930_v53 = vmax.f32 %v658_v51, 0.0 }
 0x151   :  { %v4898_v25 = vpack.c.bf16 %v927_v35, %v911_v32  ;;  %v4902_v54 = vpack.c.bf16 %v929_v49, %v913_v38  ;;  %v4160_v32 = vld [vmem:[%s5122_s3] ss:$16 sps:$4 sm:$0xff]   ;;  %v4162_v35 = vld [vmem:[%s5122_s3 + $0x4] ss:$16 sps:$4 sm:$0xff]  }
 0x152   :  { %v4900_v52 = vpack.c.bf16 %v928_v41, %v912_v33  ;;  %v4904_v55 = vpack.c.bf16 %v930_v53, %v914_v44  ;;  %1506 = vmatprep.subr.bf16.mxu1 %v4162_v35 }
 0x154   :  { %v695_v63 = vpop.f32.mrb[48].mxu0  ;;  %v768_v24 = vpop.f32.mrb[48].mxu1 }
 0x155   :  { %v819_v15 = vmax.f32 %v695_v63, 0.0  ;;  %v697_v56 = vpop.f32.mrb[49].mxu0  ;;  %1190 = vmatpush1.bf16.xpose.msra.mxu0 %v4854_v23  ;;  %v821_v61 = vmax.f32 %v768_v24, 0.0  ;;  %v770_v0 = vpop.f32.mrb[49].mxu1  ;;  %v3802_v23 = vcombine.high %v935_v2, %v935_v2  ;;  %v4168_v63 = vld [vmem:[%s5122_s3 + $0x44] ss:$16 sps:$4 sm:$0xff]  }
 0x156   :  { %v820_v57 = vmax.f32 %v697_v56, 0.0  ;;  %v699_v58 = vpop.f32.mrb[50].mxu0  ;;  %1223 = vmatprep.subr.bf16.mxu0 %v4868_v46  ;;  %v822_v9 = vmax.f32 %v770_v0, 0.0  ;;  %v772_v10 = vpop.f32.mrb[50].mxu1 }
 0x157   :  { %v835_v59 = vmax.f32 %v699_v58, 0.0  ;;  %v701_v60 = vpop.f32.mrb[51].mxu0  ;;  %v837_v45 = vmax.f32 %v772_v10, 0.0  ;;  %v774_v13 = vpop.f32.mrb[51].mxu1  ;;  %1095 = vmatprep.mubr.bf16.mxu1 %v3802_v23 }
 0x158   :  { %v836_v22 = vmax.f32 %v701_v60, 0.0  ;;  %v838_v46 = vmax.f32 %v774_v13, 0.0  ;;  %1096 = vmatmul.mubr.bf16.vlgmr.msra.gmra.mrb[64].mxu1 %v3801_v11 }
 0x159   :  { %v4916_v12 = vpack.c.bf16 %v835_v59, %v819_v15  ;;  %v4924_v18 = vpack.c.bf16 %v837_v45, %v821_v61  ;;  %1538 = vmatprep.mubr.bf16.mxu1 %v4600_v3  ;;  %1507 = vmatpush1.bf16.msra.mxu1 %v4160_v32  ;;  %v4166_v61 = vld [vmem:[%s5122_s3 + $0x40] ss:$16 sps:$4 sm:$0xff]  }
 0x15a   :  { %v4920_v16 = vpack.c.bf16 %v836_v22, %v820_v57  ;;  %v4926_v20 = vpack.c.bf16 %v838_v46, %v822_v9 }
 0x15c   :  { %v705_v19 = vpop.f32.mrb[52].mxu0  ;;  %1216 = vmatmul.mubr.bf16.vlgmr.msra.gmra.mrb[64].mxu0 %v3807_v14  ;;  %v778_v31 = vpop.f32.mrb[52].mxu1 }
 0x15d   :  { %v851_v26 = vmax.f32 %v705_v19, 0.0  ;;  %v707_v27 = vpop.f32.mrb[53].mxu0  ;;  %1224 = vmatpush1.bf16.xpose.msra.mxu0 %v4864_v39  ;;  %1255 = vmatprep.mubr.bf16.mxu0 %v3810_v17  ;;  %v853_v34 = vmax.f32 %v778_v31, 0.0  ;;  %v780_v1 = vpop.f32.mrb[53].mxu1  ;;  %v4165_v39 = vld [vmem:[%s5122_s3 + $0x24] ss:$16 sps:$4 sm:$0xff]  }
 0x15e   :  { %v852_v29 = vmax.f32 %v707_v27, 0.0  ;;  %v709_v36 = vpop.f32.mrb[54].mxu0  ;;  %1225 = vmatprep.subr.bf16.mxu0 %v4880_v5  ;;  %v854_v38 = vmax.f32 %v780_v1, 0.0  ;;  %v782_v40 = vpop.f32.mrb[54].mxu1  ;;  %v4163_v5 = vld [vmem:[%s5122_s3 + $0x20] ss:$16 sps:$4 sm:$0xff]   ;;  %1508 = vmatprep.subr.bf16.mxu1 %v4165_v39 }
 0x15f   :  { %v867_v43 = vmax.f32 %v709_v36, 0.0  ;;  %v711_v33 = vpop.f32.mrb[55].mxu0  ;;  %v869_v44 = vmax.f32 %v782_v40, 0.0  ;;  %v784_v47 = vpop.f32.mrb[55].mxu1  ;;  %1509 = vmatpush1.bf16.msra.mxu1 %v4163_v5 }
 0x160   :  { %v868_v37 = vmax.f32 %v711_v33, 0.0  ;;  %v870_v51 = vmax.f32 %v784_v47, 0.0  ;;  %1510 = vmatprep.subr.bf16.mxu1 %v4168_v63 }
 0x161   :  { %v4937_v41 = vpack.c.bf16 %v867_v43, %v851_v26  ;;  %v4947_v53 = vpack.c.bf16 %v869_v44, %v853_v34 }
 0x162   :  { %v4942_v49 = vpack.c.bf16 %v868_v37, %v852_v29  ;;  %v4952_v56 = vpack.c.bf16 %v870_v51, %v854_v38 }
 0x163   :  { %1511 = vmatpush1.bf16.msra.mxu1 %v4166_v61  ;;  %v4227_v61 = vld [vmem:[#allocation3 + $0x6a8] ss:$16 sps:$4 sm:$0xff]  }
 0x164   :  { %v715_v15 = vpop.f32.mrb[56].mxu0  ;;  %v788_v60 = vpop.f32.mrb[56].mxu1 }
 0x165   :  { %v883_v57 = vmax.f32 %v715_v15, 0.0  ;;  %v717_v58 = vpop.f32.mrb[57].mxu0  ;;  %1226 = vmatpush1.bf16.xpose.msra.mxu0 %v4878_v62  ;;  %v885_v22 = vmax.f32 %v788_v60, 0.0  ;;  %v790_v9 = vpop.f32.mrb[57].mxu1  ;;  %v4205_v15 = vld [vmem:[#allocation3 + $0x62c] ss:$16 sps:$4 sm:$0xff]  }
 0x166   :  { %v884_v24 = vmax.f32 %v717_v58, 0.0  ;;  %v719_v59 = vpop.f32.mrb[58].mxu0  ;;  %1227 = vmatprep.subr.bf16.mxu0 %v4890_v28  ;;  %v886_v11 = vmax.f32 %v790_v9, 0.0  ;;  %v792_v23 = vpop.f32.mrb[58].mxu1  ;;  %v4215_v58 = vld [vmem:[#allocation3 + $0x668] ss:$16 sps:$4 sm:$0xff]  }
 0x167   :  { %v899_v0 = vmax.f32 %v719_v59, 0.0  ;;  %v721_v2 = vpop.f32.mrb[59].mxu0  ;;  %v901_v13 = vmax.f32 %v792_v23, 0.0  ;;  %v794_v14 = vpop.f32.mrb[59].mxu1  ;;  %v4221_v59 = vld [vmem:[#allocation3 + $0x688] ss:$16 sps:$4 sm:$0xff]  }
 0x168   :  { %v900_v10 = vmax.f32 %v721_v2, 0.0  ;;  %v902_v17 = vmax.f32 %v794_v14, 0.0  ;;  %v4223_v60 = vld [vmem:[#allocation3 + $0x68c] ss:$16 sps:$4 sm:$0xff]   ;;  %v4233_v2 = vld [vmem:[#allocation3 + $0x6c8] ss:$16 sps:$4 sm:$0xff]  }
 0x169   :  { %v987_v45 = vpack.c.bf16 %v899_v0, %v883_v57  ;;  %v989_v19 = vpack.c.bf16 %v901_v13, %v885_v22  ;;  %v4211_v57 = vld [vmem:[#allocation3 + $0x64c] ss:$16 sps:$4 sm:$0xff]  }
 0x16a   :  { %v988_v46 = vpack.c.bf16 %v900_v10, %v884_v24  ;;  %v990_v27 = vpack.c.bf16 %v902_v17, %v886_v11  ;;  %v4217_v24 = vld [vmem:[#allocation3 + $0x66c] ss:$16 sps:$4 sm:$0xff]   ;;  %v4175_v17 = vld [vmem:[%s5122_s3 + $0x28] ss:$16 sps:$4 sm:$0xff]  }
 0x16b   :  { %v4229_v0 = vld [vmem:[#allocation3 + $0x6ac] ss:$16 sps:$4 sm:$0xff]  }
 0x16c   :  { %v725_v26 = vpop.f32.mrb[60].mxu0  ;;  %v798_v32 = vpop.f32.mrb[60].mxu1  ;;  %v4235_v22 = vld [vmem:[#allocation3 + $0x6cc] ss:$16 sps:$4 sm:$0xff]  }
 0x16d   :  { %v915_v62 = vmax.f32 %v725_v26, 0.0  ;;  %v727_v29 = vpop.f32.mrb[61].mxu0  ;;  %1228 = vmatpush1.bf16.xpose.msra.mxu0 %v4888_v21  ;;  %v917_v33 = vmax.f32 %v798_v32, 0.0  ;;  %v800_v34 = vpop.f32.mrb[61].mxu1  ;;  %v940_v21 = vld [vmem:[%s5120_s1 + $0x28] sm:$0xff] }
 0x16e   :  { %v916_v36 = vmax.f32 %v727_v29, 0.0  ;;  %v729_v31 = vpop.f32.mrb[62].mxu0  ;;  %1229 = vmatprep.subr.bf16.mxu0 %v4900_v52  ;;  %v918_v35 = vmax.f32 %v800_v34, 0.0  ;;  %v802_v37 = vpop.f32.mrb[62].mxu1  ;;  %v3809_v52 = vcombine.low %v4914_v6, %v4914_v6  ;;  %v3812_v63 = vcombine.high %v940_v21, %v940_v21  ;;  %v4171_v6 = vld [vmem:[%s5122_s3 + $0x64] ss:$16 sps:$4 sm:$0xff]  }
 0x16f   :  { %v931_v28 = vmax.f32 %v729_v31, 0.0  ;;  %v731_v43 = vpop.f32.mrb[63].mxu0  ;;  %v933_v40 = vmax.f32 %v802_v37, 0.0  ;;  %v804_v44 = vpop.f32.mrb[63].mxu1  ;;  %1512 = vmatprep.subr.bf16.mxu1 %v4171_v6  ;;  %v4178_v26 = vld [vmem:[%s5122_s3 + $0x48] ss:$16 sps:$4 sm:$0xff]  }
 0x170   :  { %v932_v1 = vmax.f32 %v731_v43, 0.0  ;;  %v934_v39 = vmax.f32 %v804_v44, 0.0  ;;  %v4181_v29 = vld [vmem:[%s5122_s3 + $0x68] ss:$16 sps:$4 sm:$0xff]   ;;  %v4190_v37 = vld [vmem:[#allocation3 + $0x404] ss:$16 sps:$4 sm:$0xff]  }
 0x171   :  { %v1003_v38 = vpack.c.bf16 %v931_v28, %v915_v62  ;;  %v1005_v51 = vpack.c.bf16 %v933_v40, %v917_v33  ;;  %v1594_v62 = vld [vmem:[%s5125_s6] sm:$0xff]  ;;  %v1595_v32 = vld [vmem:[%s5125_s6 + $0x8] sm:$0xff] }
 0x172   :  { %v1004_v47 = vpack.c.bf16 %v932_v1, %v916_v36  ;;  %v1006_v5 = vpack.c.bf16 %v934_v39, %v918_v35  ;;  %v3836_v36 = vcombine.high %v1594_v62, %v1594_v62  ;;  %v3835_v31 = vcombine.low %v1594_v62, %v1594_v62  ;;  %v1592_v33 = vld [vmem:[%s5124_s5] sm:$0xff]  ;;  %v4239_v6 = vld [vmem:[#allocation3 + $0x6e8] ss:$16 sps:$4 sm:$0xff]  }
 0x173   :  { %v3838_v43 = vcombine.high %v1595_v32, %v1595_v32  ;;  %v3837_v34 = vcombine.low %v1595_v32, %v1595_v32  ;;  %v1593_v1 = vpack.c.bf16 %v1592_v33, %v1592_v33  ;;  %v4193_v40 = vld [vmem:[#allocation3 + $0x424] ss:$16 sps:$4 sm:$0xff]   ;;  %v4191_v44 = vld [vmem:[#allocation3 + $0x420] ss:$16 sps:$4 sm:$0xff]  }
 0x174   :  { %v1634_v28 = vsel %vm1632_vm3, %v3835_v31, 0  ;;  %v4194_v39 = vld [vmem:[#allocation3 + $0x440] ss:$16 sps:$4 sm:$0xff]  }
 0x175   :  { %1230 = vmatpush1.bf16.xpose.msra.mxu0 %v4898_v25  ;;  %v1640_v35 = vsel %vm1632_vm3, %v3837_v34, 0  ;;  %v1596_v33 = vld [vmem:[%s5126_s7] sm:$0xf]  ;;  %v5043_v34 = vsub.s32 0, %v4681_v4 }
 0x176   :  { %1263 = vmatprep.subr.bf16.mxu0 %v4874_v50  ;;  %v941_v50 = vld [vmem:[%s5120_s1 + $0x30] sm:$0xff] }
 0x177   :  { %v3814_v25 = vcombine.high %v941_v50, %v941_v50 }
 0x17c   :  { %1256 = vmatmul.mubr.bf16.vlgmr.msra.gmra.mrb[64].mxu0 %v3809_v52  ;;  %v4206_v52 = vld [vmem:[#allocation3 + $0x480] ss:$16 sps:$4 sm:$0xff]  }
 0x17d   :  { %1264 = vmatpush1.bf16.xpose.msra.mxu0 %v4872_v48  ;;  %1295 = vmatprep.mubr.bf16.mxu0 %v3812_v63  ;;  %v3811_v48 = vcombine.low %v940_v21, %v940_v21  ;;  %v4208_v21 = vld [vmem:[#allocation3 + $0x484] ss:$16 sps:$4 sm:$0xff]   ;;  %v4212_v63 = vld [vmem:[#allocation3 + $0x4a0] ss:$16 sps:$4 sm:$0xff]  }
 0x17e   :  { %1265 = vmatprep.subr.bf16.mxu0 %v4884_v8  ;;  %v3813_v8 = vcombine.low %v941_v50, %v941_v50  ;;  %v4220_v50 = vld [vmem:[#allocation3 + $0x4c4] ss:$16 sps:$4 sm:$0xff]  }
 0x185   :  { %1266 = vmatpush1.bf16.xpose.msra.mxu0 %v4882_v7  ;;  %v942_v7 = vld [vmem:[%s5120_s1 + $0x38] sm:$0xff] }
 0x186   :  { %1267 = vmatprep.subr.bf16.mxu0 %v4894_v42  ;;  %v3815_v42 = vcombine.low %v942_v7, %v942_v7 }
 0x18d   :  { %1268 = vmatpush1.bf16.xpose.msra.mxu0 %v4892_v30  ;;  %v3816_v30 = vcombine.high %v942_v7, %v942_v7  ;;  %v4224_v7 = vld [vmem:[#allocation3 + $0x4e0] ss:$16 sps:$4 sm:$0xff]  }
 0x18e   :  { %1269 = vmatprep.subr.bf16.mxu0 %v4904_v55 }
 0x195   :  { %1270 = vmatpush1.bf16.xpose.msra.mxu0 %v4902_v54 }
 0x196   :  { %1303 = vmatprep.subr.bf16.mxu0 %v4920_v16  ;;  %v4169_v16 = vld [vmem:[%s5122_s3 + $0x60] ss:$16 sps:$4 sm:$0xff]  }
 0x197   :  { %1513 = vmatpush1.bf16.msra.mxu1 %v4169_v16  ;;  %v4244_v16 = vld [vmem:[#allocation3 + $0x544] ss:$16 sps:$4 sm:$0xff]  }
 0x19c   :  { %1296 = vmatmul.mubr.bf16.vlgmr.msra.gmra.mrb[64].mxu0 %v3811_v48  ;;  %v4218_v48 = vld [vmem:[#allocation3 + $0x4c0] ss:$16 sps:$4 sm:$0xff]  }
 0x19d   :  { %1304 = vmatpush1.bf16.xpose.msra.mxu0 %v4916_v12  ;;  %1335 = vmatprep.mubr.bf16.mxu0 %v3814_v25  ;;  %v4226_v25 = vld [vmem:[#allocation3 + $0x4e4] ss:$16 sps:$4 sm:$0xff]  }
 0x19e   :  { %1305 = vmatprep.subr.bf16.mxu0 %v4942_v49  ;;  %v4199_v49 = vld [vmem:[#allocation3 + $0x60c] ss:$16 sps:$4 sm:$0xff]  }
 0x1a5   :  { %1306 = vmatpush1.bf16.xpose.msra.mxu0 %v4937_v41  ;;  %v4197_v41 = vld [vmem:[#allocation3 + $0x608] ss:$16 sps:$4 sm:$0xff]  }
 0x1a6   :  { %1307 = vmatprep.subr.bf16.mxu0 %v988_v46  ;;  %v4177_v46 = vld [vmem:[%s5122_s3 + $0x2c] ss:$16 sps:$4 sm:$0xff]  }
 0x1ad   :  { %1308 = vmatpush1.bf16.xpose.msra.mxu0 %v987_v45  ;;  %v4172_v45 = vld [vmem:[%s5122_s3 + $0x8] ss:$16 sps:$4 sm:$0xff]  }
 0x1ae   :  { %1309 = vmatprep.subr.bf16.mxu0 %v1004_v47  ;;  %v4196_v47 = vld [vmem:[#allocation3 + $0x444] ss:$16 sps:$4 sm:$0xff]  }
 0x1b5   :  { %1310 = vmatpush1.bf16.xpose.msra.mxu0 %v1003_v38  ;;  %v4188_v38 = vld [vmem:[#allocation3 + $0x400] ss:$16 sps:$4 sm:$0xff]  }
 0x1b6   :  { %1343 = vmatprep.subr.bf16.mxu0 %v4926_v20  ;;  %v4174_v20 = vld [vmem:[%s5122_s3 + $0xc] ss:$16 sps:$4 sm:$0xff]  }
 0x1b7   :  { %1547 = vmatprep.subr.bf16.mxu1 %v4174_v20  ;;  %v4247_v20 = vld [vmem:[#allocation3 + $0x70c] ss:$16 sps:$4 sm:$0xff]  }
 0x1bc   :  { %1336 = vmatmul.mubr.bf16.vlgmr.msra.gmra.mrb[64].mxu0 %v3813_v8  ;;  %v4232_v8 = vld [vmem:[#allocation3 + $0x504] ss:$16 sps:$4 sm:$0xff]  }
 0x1bd   :  { %1344 = vmatpush1.bf16.xpose.msra.mxu0 %v4924_v18  ;;  %1375 = vmatprep.mubr.bf16.mxu0 %v3816_v30  ;;  %v4230_v30 = vld [vmem:[#allocation3 + $0x500] ss:$16 sps:$4 sm:$0xff]  }
 0x1be   :  { %1345 = vmatprep.subr.bf16.mxu0 %v4952_v56  ;;  %v4209_v56 = vld [vmem:[#allocation3 + $0x648] ss:$16 sps:$4 sm:$0xff]  }
 0x1c5   :  { %1346 = vmatpush1.bf16.xpose.msra.mxu0 %v4947_v53  ;;  %v4203_v53 = vld [vmem:[#allocation3 + $0x628] ss:$16 sps:$4 sm:$0xff]  }
 0x1c6   :  { %1347 = vmatprep.subr.bf16.mxu0 %v990_v27  ;;  %v4183_v27 = vld [vmem:[%s5122_s3 + $0x6c] ss:$16 sps:$4 sm:$0xff]  }
 0x1cd   :  { %1348 = vmatpush1.bf16.xpose.msra.mxu0 %v989_v19  ;;  %v4180_v19 = vld [vmem:[%s5122_s3 + $0x4c] ss:$16 sps:$4 sm:$0xff]  }
 0x1ce   :  { %1349 = vmatprep.subr.bf16.mxu0 %v1006_v5  ;;  %v4200_v5 = vld [vmem:[#allocation3 + $0x460] ss:$16 sps:$4 sm:$0xff]  }
 0x1d5   :  { %1350 = vmatpush1.bf16.xpose.msra.mxu0 %v1005_v51  ;;  %v4202_v51 = vld [vmem:[#allocation3 + $0x464] ss:$16 sps:$4 sm:$0xff]  }
 0x1d6   :  { %2759 = vmatprep.subr.bf16.mxu0 %v4199_v49  ;;  %v4253_v49 = vld [vmem:[#allocation3 + $0x72c] ss:$16 sps:$4 sm:$0xff]  }
 0x1dc   :  { %1376 = vmatmul.mubr.bf16.vlgmr.msra.gmra.mrb[64].mxu0 %v3815_v42  ;;  %v4238_v42 = vld [vmem:[#allocation3 + $0x524] ss:$16 sps:$4 sm:$0xff]  }
 0x1dd   :  { %2760 = vmatpush1.bf16.msra.mxu0 %v4197_v41  ;;  %v4250_v41 = vld [vmem:[#allocation3 + $0x564] ss:$16 sps:$4 sm:$0xff]  }
 0x1de   :  { %2761 = vmatprep.subr.bf16.mxu0 %v4205_v15  ;;  %v4251_v15 = vld [vmem:[#allocation3 + $0x728] ss:$16 sps:$4 sm:$0xff]  }
 0x1e1   :  { %2762 = vmatpush1.bf16.msra.mxu0 %v4203_v53  ;;  %v4248_v53 = vld [vmem:[#allocation3 + $0x560] ss:$16 sps:$4 sm:$0xff]  }
 0x1e2   :  { %2763 = vmatprep.subr.bf16.mxu0 %v4211_v57  ;;  %v4259_v57 = vld [vmem:[#allocation3 + $0x74c] ss:$16 sps:$4 sm:$0xff]  }
 0x1e5   :  { %2764 = vmatpush1.bf16.msra.mxu0 %v4209_v56  ;;  %v4256_v56 = vld [vmem:[#allocation3 + $0x584] ss:$16 sps:$4 sm:$0xff]  }
 0x1e6   :  { %2765 = vmatprep.subr.bf16.mxu0 %v4217_v24  ;;  %v4257_v24 = vld [vmem:[#allocation3 + $0x748] ss:$16 sps:$4 sm:$0xff]  }
 0x1e9   :  { %2766 = vmatpush1.bf16.msra.mxu0 %v4215_v58  ;;  %v4254_v58 = vld [vmem:[#allocation3 + $0x580] ss:$16 sps:$4 sm:$0xff]  }
 0x1ea   :  { %2767 = vmatprep.subr.bf16.mxu0 %v4223_v60  ;;  %v4265_v60 = vld [vmem:[#allocation3 + $0x76c] ss:$16 sps:$4 sm:$0xff]  }
 0x1ed   :  { %2768 = vmatpush1.bf16.msra.mxu0 %v4221_v59  ;;  %v4262_v59 = vld [vmem:[#allocation3 + $0x5a4] ss:$16 sps:$4 sm:$0xff]  }
 0x1ee   :  { %2769 = vmatprep.subr.bf16.mxu0 %v4229_v0  ;;  %v4263_v0 = vld [vmem:[#allocation3 + $0x768] ss:$16 sps:$4 sm:$0xff]  }
 0x1f1   :  { %2770 = vmatpush1.bf16.msra.mxu0 %v4227_v61  ;;  %v4260_v61 = vld [vmem:[#allocation3 + $0x5a0] ss:$16 sps:$4 sm:$0xff]  }
 0x1f2   :  { %2771 = vmatprep.subr.bf16.mxu0 %v4235_v22  ;;  %v4271_v22 = vld [vmem:[#allocation3 + $0x78c] ss:$16 sps:$4 sm:$0xff]  }
 0x1f5   :  { %2772 = vmatpush1.bf16.msra.mxu0 %v4233_v2  ;;  %v4268_v2 = vld [vmem:[#allocation3 + $0x5c4] ss:$16 sps:$4 sm:$0xff]  }
 0x22b   :  { %v1097_v54 = vpop.f32.mrb[64].mxu1 }
 0x22c   :  { %v1099_v55 = vpop.f32.mrb[65].mxu1 }
 0x22d   :  { %v1100_v12 = vpop.f32.mrb[66].mxu1  ;;  %v4236_v55 = vld [vmem:[#allocation3 + $0x520] ss:$16 sps:$4 sm:$0xff]  }
 0x22e   :  { %v1101_v18 = vpop.f32.mrb[67].mxu1  ;;  %v4242_v12 = vld [vmem:[#allocation3 + $0x540] ss:$16 sps:$4 sm:$0xff]  }
 0x22f   :  { %v4245_v18 = vld [vmem:[#allocation3 + $0x708] ss:$16 sps:$4 sm:$0xff]  }
 0x2af   :  { %v1377_v9 = vpop.f32.mrb[64].mxu0 }
 0x2b0   :  { %v4100_v10 = vadd.f32 %v1377_v9, %v1097_v54  ;;  %v1379_v11 = vpop.f32.mrb[65].mxu0  ;;  %v4241_v54 = vld [vmem:[#allocation3 + $0x6ec] ss:$16 sps:$4 sm:$0xff]   ;;  %v4266_v9 = vld [vmem:[#allocation3 + $0x5c0] ss:$16 sps:$4 sm:$0xff]  }
 0x2b1   :  { %v1380_v23 = vpop.f32.mrb[66].mxu0  ;;  %2773 = vmatprep.subr.bf16.mxu0 %v4241_v54  ;;  %v4274_v11 = vld [vmem:[#allocation3 + $0x5e4] ss:$16 sps:$4 sm:$0xff]  }
 0x2b2   :  { %v1383_v13 = vpack.c.bf16 %v4100_v10, %v4100_v10  ;;  %v1381_v14 = vpop.f32.mrb[67].mxu0  ;;  %2774 = vmatpush1.bf16.msra.mxu0 %v4239_v6  ;;  %v4269_v10 = vld [vmem:[#allocation3 + $0x788] ss:$16 sps:$4 sm:$0xff]   ;;  %v4277_v23 = vld [vmem:[#allocation3 + $0x7ac] ss:$16 sps:$4 sm:$0xff]  }
 0x2b3   :  { %2775 = vmatprep.subr.bf16.mxu0 %v4247_v20  ;;  %v4280_v14 = vld [vmem:[#allocation3 + $0x604] ss:$16 sps:$4 sm:$0xff]   ;;  %v4284_v20 = vld [vmem:[#allocation3 + $0x620] ss:$16 sps:$4 sm:$0xff]  }
 0x2b4   :  { %3833 = vmatmul.mubr.msk.bf16.vlgmr.msra.gmra.mrb[68].mxu1 %vm1502_vm2, %v1383_v13  ;;  %v4286_v54 = vld [vmem:[#allocation3 + $0x624] ss:$16 sps:$4 sm:$0xff]  }
 0x2b5   :  { %1548 = vmatpush1.bf16.msra.mxu1 %v4172_v45  ;;  %1579 = vmatprep.mubr.bf16.mxu1 %v4600_v3  ;;  %v4272_v45 = vld [vmem:[#allocation3 + $0x5e0] ss:$16 sps:$4 sm:$0xff]  }
 0x2b6   :  { %1549 = vmatprep.subr.bf16.mxu1 %v4177_v46  ;;  %2776 = vmatpush1.bf16.msra.mxu0 %v4245_v18  ;;  %v4283_v46 = vld [vmem:[#allocation3 + $0x7cc] ss:$16 sps:$4 sm:$0xff]  }
 0x2b7   :  { %2777 = vmatprep.subr.bf16.mxu0 %v4253_v49 }
 0x2b9   :  { %1550 = vmatpush1.bf16.msra.mxu1 %v4175_v17  ;;  %v4281_v17 = vld [vmem:[#allocation3 + $0x7c8] ss:$16 sps:$4 sm:$0xff]  }
 0x2ba   :  { %1551 = vmatprep.subr.bf16.mxu1 %v4180_v19  ;;  %2778 = vmatpush1.bf16.msra.mxu0 %v4251_v15  ;;  %v4289_v19 = vld [vmem:[#allocation3 + $0x7ec] ss:$16 sps:$4 sm:$0xff]  }
 0x2bb   :  { %2779 = vmatprep.subr.bf16.mxu0 %v4259_v57 }
 0x2bd   :  { %1552 = vmatpush1.bf16.msra.mxu1 %v4178_v26  ;;  %v4287_v26 = vld [vmem:[#allocation3 + $0x7e8] ss:$16 sps:$4 sm:$0xff]  }
 0x2be   :  { %1553 = vmatprep.subr.bf16.mxu1 %v4183_v27  ;;  %2780 = vmatpush1.bf16.msra.mxu0 %v4257_v24  ;;  %v4295_v27 = vld [vmem:[#allocation3 + $0x204] ss:$16 sps:$4 sm:$0xff]  }
 0x2bf   :  { %2781 = vmatprep.subr.bf16.mxu0 %v4265_v60  ;;  %v4293_v60 = vld [vmem:[#allocation3 + $0x200] ss:$16 sps:$4 sm:$0xff]  }
 0x2c1   :  { %1554 = vmatpush1.bf16.msra.mxu1 %v4181_v29 }
 0x2c2   :  { %3839 = vmatprep.subr.msk.bf16.mxu1 %vm1632_vm3, %v3836_v36  ;;  %2782 = vmatpush1.bf16.msra.mxu0 %v4263_v0  ;;  %v4301_v0 = vld [vmem:[#allocation3 + $0x224] ss:$16 sps:$4 sm:$0xff]  }
 0x2c3   :  { %2783 = vmatprep.subr.bf16.mxu0 %v4271_v22  ;;  %v4296_v22 = vld [vmem:[#allocation3 + $0x660] ss:$16 sps:$4 sm:$0xff]  }
 0x2c4   :  { %3834 = vmatmul.mubr.msk.bf16.vlgmr.msra.gmra.mrb[72].mxu1 %vm1502_vm2, %v1383_v13  ;;  %v4275_v13 = vld [vmem:[#allocation3 + $0x7a8] ss:$16 sps:$4 sm:$0xff]  }
 0x2c5   :  { %1646 = vmatpush1.bf16.msra.mxu1 %v1634_v28  ;;  %1677 = vmatprep.mubr.bf16.mxu1 %v4600_v3 }
 0x2c6   :  { %3841 = vmatprep.subr.msk.bf16.mxu1 %vm1632_vm3, %v3838_v43  ;;  %2784 = vmatpush1.bf16.msra.mxu0 %v4269_v10  ;;  %v4304_v10 = vld [vmem:[#allocation3 + $0x684] ss:$16 sps:$4 sm:$0xff]  }
 0x2c7   :  { %2785 = vmatprep.subr.bf16.mxu0 %v4277_v23  ;;  %v4302_v23 = vld [vmem:[#allocation3 + $0x680] ss:$16 sps:$4 sm:$0xff]  }
 0x2ca   :  { %2786 = vmatpush1.bf16.msra.mxu0 %v4275_v13  ;;  %v4310_v13 = vld [vmem:[#allocation3 + $0x6a4] ss:$16 sps:$4 sm:$0xff]  }
 0x2cb   :  { %2787 = vmatprep.subr.bf16.mxu0 %v4283_v46  ;;  %v4308_v46 = vld [vmem:[#allocation3 + $0x6a0] ss:$16 sps:$4 sm:$0xff]  }
 0x2cc   :  { %3840 = vmatmul.mubr.msk.bf16.vlgmr.msra.gmra.mrb[76].mxu1 %vm1628_vm4, %v1593_v1 }
 0x2cd   :  { %1687 = vmatpush1.bf16.msra.mxu1 %v1640_v35  ;;  %1718 = vmatprep.mubr.bf16.mxu1 %v4600_v3  ;;  %v4214_v3 = vld [vmem:[#allocation3 + $0x4a4] ss:$16 sps:$4 sm:$0xff]   ;;  %v5046_v35 = vsub.s32 1, %v4681_v4 }
 0x2ce   :  { %2636 = vmatprep.subr.bf16.mxu1 %v4190_v37  ;;  %2788 = vmatpush1.bf16.msra.mxu0 %v4281_v17  ;;  %v1601_v37 = vrot.slane %v1596_v33, %v5043_v34  ;;  %v4311_v17 = vld [vmem:[#allocation3 + $0x260] ss:$16 sps:$4 sm:$0xff]  }
 0x2cf   :  { %2789 = vmatprep.subr.bf16.mxu0 %v4289_v19  ;;  %v4316_v19 = vld [vmem:[#allocation3 + $0x6c4] ss:$16 sps:$4 sm:$0xff]  }
 0x2d2   :  { %2790 = vmatpush1.bf16.msra.mxu0 %v4287_v26  ;;  %v4319_v26 = vld [vmem:[#allocation3 + $0x284] ss:$16 sps:$4 sm:$0xff]  }
 0x2d3   :  { %3481 = vmatprep.subr.bf16.mxu0 %v4295_v27  ;;  %v4314_v27 = vld [vmem:[#allocation3 + $0x6c0] ss:$16 sps:$4 sm:$0xff]  }
 0x2d4   :  { %3842 = vmatmul.mubr.msk.bf16.vlgmr.msra.gmra.mrb[80].mxu1 %vm1628_vm4, %v1593_v1 }
 0x2d5   :  { %2637 = vmatpush1.bf16.msra.mxu1 %v4188_v38  ;;  %v1605_v38 = vrot.slane %v1596_v33, %v5046_v35 }
 0x2d6   :  { %2638 = vmatprep.subr.bf16.mxu1 %v4193_v40 }
 0x2d9   :  { %2639 = vmatpush1.bf16.msra.mxu1 %v4191_v44  ;;  %v5051_v44 = vsub.s32 3, %v4681_v4 }
 0x2da   :  { %2640 = vmatprep.subr.bf16.mxu1 %v4196_v47 }
 0x2dd   :  { %2641 = vmatpush1.bf16.msra.mxu1 %v4194_v39 }
 0x2de   :  { %2642 = vmatprep.subr.bf16.mxu1 %v4202_v51 }
 0x2e1   :  { %2643 = vmatpush1.bf16.msra.mxu1 %v4200_v5 }
 0x2e2   :  { %2644 = vmatprep.subr.bf16.mxu1 %v4208_v21  ;;  %v5054_v21 = vsub.s32 2, %v4681_v4 }
 0x2e5   :  { %2645 = vmatpush1.bf16.msra.mxu1 %v4206_v52 }
 0x2e6   :  { %2646 = vmatprep.subr.bf16.mxu1 %v4214_v3 }
 0x2e9   :  { %2647 = vmatpush1.bf16.msra.mxu1 %v4212_v63  ;;  %v5059_v63 = vld [vmem:[%s5123_s4] sm:$0xf] }
 0x2ea   :  { %2648 = vmatprep.subr.bf16.mxu1 %v4220_v50 }
 0x2ed   :  { %2649 = vmatpush1.bf16.msra.mxu1 %v4218_v48  ;;  %v1417_v48 = vrot.slane %v5059_v63, %v5051_v44 }
 0x2ee   :  { %2650 = vmatprep.subr.bf16.mxu1 %v4226_v25  ;;  %v1609_v25 = vrot.slane %v1596_v33, %v5054_v21 }
 0x2f1   :  { %2651 = vmatpush1.bf16.msra.mxu1 %v4224_v7 }
 0x2f2   :  { %2652 = vmatprep.subr.bf16.mxu1 %v4232_v8  ;;  %v4278_v8 = vld [vmem:[#allocation3 + $0x600] ss:$16 sps:$4 sm:$0xff]  }
 0x2f5   :  { %2653 = vmatpush1.bf16.msra.mxu1 %v4230_v30  ;;  %v1613_v30 = vrot.slane %v1596_v33, %v5051_v44  ;;  %v4323_v33 = vld [vmem:[#allocation3 + $0x2a0] ss:$16 sps:$4 sm:$0xff]  }
 0x2f6   :  { %2654 = vmatprep.subr.bf16.mxu1 %v4238_v42 }
 0x2f9   :  { %2655 = vmatpush1.bf16.msra.mxu1 %v4236_v55 }
 0x2fa   :  { %2656 = vmatprep.subr.bf16.mxu1 %v4244_v16 }
 0x2fd   :  { %2657 = vmatpush1.bf16.msra.mxu1 %v4242_v12 }
 0x2fe   :  { %2658 = vmatprep.subr.bf16.mxu1 %v4250_v41 }
 0x301   :  { %2659 = vmatpush1.bf16.msra.mxu1 %v4248_v53  ;;  %v4292_v53 = vld [vmem:[#allocation3 + $0x644] ss:$16 sps:$4 sm:$0xff]  }
 0x302   :  { %2660 = vmatprep.subr.bf16.mxu1 %v4256_v56 }
 0x305   :  { %2661 = vmatpush1.bf16.msra.mxu1 %v4254_v58 }
 0x306   :  { %2662 = vmatprep.subr.bf16.mxu1 %v4262_v59  ;;  %v4290_v59 = vld [vmem:[#allocation3 + $0x640] ss:$16 sps:$4 sm:$0xff]  }
 0x309   :  { %2663 = vmatpush1.bf16.msra.mxu1 %v4260_v61  ;;  %v4298_v61 = vld [vmem:[#allocation3 + $0x664] ss:$16 sps:$4 sm:$0xff]  }
 0x30a   :  { %2664 = vmatprep.subr.bf16.mxu1 %v4268_v2 }
 0x30d   :  { %2665 = vmatpush1.bf16.msra.mxu1 %v4266_v9  ;;  %v4299_v9 = vld [vmem:[#allocation3 + $0x220] ss:$16 sps:$4 sm:$0xff]  }
 0x30e   :  { %2666 = vmatprep.subr.bf16.mxu1 %v4274_v11  ;;  %v4307_v11 = vld [vmem:[#allocation3 + $0x244] ss:$16 sps:$4 sm:$0xff]  }
 0x311   :  { %2667 = vmatpush1.bf16.msra.mxu1 %v4272_v45  ;;  %v4305_v45 = vld [vmem:[#allocation3 + $0x240] ss:$16 sps:$4 sm:$0xff]  }
 0x312   :  { %2677 = vmatprep.subr.bf16.mxu1 %v4280_v14  ;;  %v4313_v14 = vld [vmem:[#allocation3 + $0x264] ss:$16 sps:$4 sm:$0xff]  }
 0x387   :  { %v5033_v62 = vpop.f32.mrb[68].mxu1 }
 0x388   :  { %v5035_v29 = vpop.f32.mrb[69].mxu1 }
 0x389   :  { %v1544_v36 = vpop.f32.mrb[70].mxu1 }
 0x38a   :  { %v1545_v31 = vpop.f32.mrb[71].mxu1  ;;  %v4317_v36 = vld [vmem:[#allocation3 + $0x280] ss:$16 sps:$4 sm:$0xff]  }
 0x38b   :  { %v4322_v31 = vld [vmem:[#allocation3 + $0x6e4] ss:$16 sps:$4 sm:$0xff]  }
 0x397   :  { %v5037_v32 = vpop.f32.mrb[72].mxu1 }
 0x398   :  { %v1583_v28 = vpop.f32.mrb[73].mxu1 }
 0x399   :  { %v1585_v43 = vpop.f32.mrb[74].mxu1  ;;  %v1584_v6 = vadd.f32 %v1583_v28, %v1417_v48  ;;  %v4325_v28 = vld [vmem:[#allocation3 + $0x2a4] ss:$16 sps:$4 sm:$0xff]   ;;  %v4341_v48 = vld [vmem:[#allocation3 + $0x300] ss:$16 sps:$4 sm:$0xff]  }
 0x39a   :  { %v1586_v1 = vpop.f32.mrb[75].mxu1  ;;  %v4320_v43 = vld [vmem:[#allocation3 + $0x6e0] ss:$16 sps:$4 sm:$0xff]  }
 0x39b   :  { %v1591_v57 = vmax.f32 %v1584_v6, 0.0  ;;  %v4328_v1 = vld [vmem:[#allocation3 + $0x704] ss:$16 sps:$4 sm:$0xff]  }
 0x39c   :  { %v4355_v6 = vld [vmem:[#allocation3 + $0x344] ss:$16 sps:$4 sm:$0xff]  }
 0x39d   :  { %v5073_v2 = vpack.c.bf16 %v1591_v57, %v1591_v57  ;;  %v4365_v57 = vld [vmem:[#allocation3 + $0x380] ss:$16 sps:$4 sm:$0xff]  }
 0x39f   :  { %v1679_v40 = vpop.f32.mrb[76].mxu1 }
 0x3a0   :  { %v1680_v47 = vadd.f32 %v1679_v40, %v1601_v37  ;;  %v1681_v39 = vpop.f32.mrb[77].mxu1  ;;  %v4331_v37 = vld [vmem:[#allocation3 + $0x2c4] ss:$16 sps:$4 sm:$0xff]   ;;  %v4329_v40 = vld [vmem:[#allocation3 + $0x2c0] ss:$16 sps:$4 sm:$0xff]  }
 0x3a1   :  { %v1682_v51 = vadd.f32 %v1681_v39, %v1605_v38  ;;  %v1683_v5 = vpop.f32.mrb[78].mxu1  ;;  %v4326_v38 = vld [vmem:[#allocation3 + $0x700] ss:$16 sps:$4 sm:$0xff]   ;;  %v4337_v39 = vld [vmem:[#allocation3 + $0x2e4] ss:$16 sps:$4 sm:$0xff]  }
 0x3a2   :  { %v1727_v52 = vmax.f32 %v1680_v47, 0.0  ;;  %v1684_v3 = vpop.f32.mrb[79].mxu1  ;;  %v4334_v47 = vld [vmem:[#allocation3 + $0x724] ss:$16 sps:$4 sm:$0xff]   ;;  %v4335_v5 = vld [vmem:[#allocation3 + $0x2e0] ss:$16 sps:$4 sm:$0xff]  }
 0x3a3   :  { %v1728_v50 = vmax.f32 %v1682_v51, 0.0  ;;  %v4332_v51 = vld [vmem:[#allocation3 + $0x720] ss:$16 sps:$4 sm:$0xff]   ;;  %v4343_v3 = vld [vmem:[#allocation3 + $0x304] ss:$16 sps:$4 sm:$0xff]  }
 0x3a4   :  { %v5067_v42 = vpack.c.bf16 %v1727_v52, %v1727_v52  ;;  %v4340_v52 = vld [vmem:[#allocation3 + $0x744] ss:$16 sps:$4 sm:$0xff]  }
 0x3a5   :  { %v5064_v7 = vpack.c.bf16 %v1728_v50, %v1728_v50  ;;  %v4338_v50 = vld [vmem:[#allocation3 + $0x740] ss:$16 sps:$4 sm:$0xff]  }
 0x3a7   :  { %v1720_v55 = vpop.f32.mrb[80].mxu1  ;;  %2668 = vmatprep.mubr.bf16.mxu1 %v5064_v7 }
 0x3a8   :  { %v1721_v12 = vadd.f32 %v1720_v55, %v1609_v25  ;;  %v1722_v16 = vpop.f32.mrb[81].mxu1  ;;  %2669 = vmatmul.mubr.bf16.vlgmr.msra.gmra.mrb[84].mxu1 %v5067_v42  ;;  %v4346_v25 = vld [vmem:[#allocation3 + $0x764] ss:$16 sps:$4 sm:$0xff]  }
 0x3a9   :  { %v1723_v18 = vadd.f32 %v1722_v16, %v1613_v30  ;;  %2678 = vmatpush1.bf16.msra.mxu1 %v4278_v8  ;;  %v1724_v41 = vpop.f32.mrb[82].mxu1  ;;  %v4349_v8 = vld [vmem:[#allocation3 + $0x324] ss:$16 sps:$4 sm:$0xff]   ;;  %v4344_v30 = vld [vmem:[#allocation3 + $0x760] ss:$16 sps:$4 sm:$0xff]  }
 0x3aa   :  { %v1729_v49 = vmax.f32 %v1721_v12, 0.0  ;;  %2679 = vmatprep.subr.bf16.mxu1 %v4286_v54  ;;  %v1725_v15 = vpop.f32.mrb[83].mxu1  ;;  %v4347_v54 = vld [vmem:[#allocation3 + $0x320] ss:$16 sps:$4 sm:$0xff]   ;;  %v4352_v55 = vld [vmem:[#allocation3 + $0x784] ss:$16 sps:$4 sm:$0xff]  }
 0x3ab   :  { %v1730_v56 = vmax.f32 %v1723_v18, 0.0  ;;  %v4350_v12 = vld [vmem:[#allocation3 + $0x780] ss:$16 sps:$4 sm:$0xff]   ;;  %v4358_v18 = vld [vmem:[#allocation3 + $0x7a4] ss:$16 sps:$4 sm:$0xff]  }
 0x3ac   :  { %v5071_v58 = vpack.c.bf16 %v1729_v49, %v1729_v49  ;;  %v4353_v16 = vld [vmem:[#allocation3 + $0x340] ss:$16 sps:$4 sm:$0xff]   ;;  %v4367_v15 = vld [vmem:[#allocation3 + $0x384] ss:$16 sps:$4 sm:$0xff]  }
 0x3ad   :  { %v1866_v24 = vpack.c.bf16 %v1730_v56, %v1730_v56  ;;  %2680 = vmatpush1.bf16.msra.mxu1 %v4284_v20  ;;  %v4361_v20 = vld [vmem:[#allocation3 + $0x364] ss:$16 sps:$4 sm:$0xff]   ;;  %v4356_v41 = vld [vmem:[#allocation3 + $0x7a0] ss:$16 sps:$4 sm:$0xff]  }
 0x3ae   :  { %2681 = vmatprep.subr.bf16.mxu1 %v4292_v53  ;;  %v4359_v49 = vld [vmem:[#allocation3 + $0x360] ss:$16 sps:$4 sm:$0xff]   ;;  %v4364_v53 = vld [vmem:[#allocation3 + $0x7c4] ss:$16 sps:$4 sm:$0xff]  }
 0x3af   :  { %2791 = vmatprep.mubr.bf16.mxu0 %v1866_v24  ;;  %2709 = vmatprep.mubr.bf16.mxu1 %v1866_v24  ;;  %v4362_v56 = vld [vmem:[#allocation3 + $0x7c0] ss:$16 sps:$4 sm:$0xff]   ;;  %v4370_v24 = vld [vmem:[#allocation3 + $0x7e4] ss:$16 sps:$4 sm:$0xff]  }
 0x3b0   :  { %2792 = vmatmul.mubr.bf16.vlgmr.msra.gmra.mrb[68].mxu0 %v5071_v58 }
 0x3b1   :  { %2682 = vmatpush1.bf16.msra.mxu1 %v4290_v59  ;;  %3482 = vmatpush1.bf16.msra.mxu0 %v4293_v60  ;;  %v4373_v59 = vld [vmem:[#allocation3 + $0x3a4] ss:$16 sps:$4 sm:$0xff]   ;;  %v4368_v60 = vld [vmem:[#allocation3 + $0x7e0] ss:$16 sps:$4 sm:$0xff]  }
 0x3b2   :  { %3513 = vmatprep.mubr.bf16.mxu0 %v5073_v2  ;;  %2683 = vmatprep.subr.bf16.mxu1 %v4298_v61  ;;  %v4371_v61 = vld [vmem:[#allocation3 + $0x3a0] ss:$16 sps:$4 sm:$0xff]  }
 0x3b3   :  { %3483 = vmatprep.subr.bf16.mxu0 %v4301_v0  ;;  %v4376_v0 = vld [vmem:[#allocation3 + $0x40c] ss:$16 sps:$4 sm:$0xff]  }
 0x3b5   :  { %2684 = vmatpush1.bf16.msra.mxu1 %v4296_v22  ;;  %3484 = vmatpush1.bf16.msra.mxu0 %v4299_v9  ;;  %v4379_v22 = vld [vmem:[#allocation3 + $0x3c4] ss:$16 sps:$4 sm:$0xff]   ;;  %v1413_v9 = vrot.slane %v5059_v63, %v5054_v21 }
 0x3b6   :  { %2685 = vmatprep.subr.bf16.mxu1 %v4304_v10  ;;  %3485 = vmatprep.subr.bf16.mxu0 %v4307_v11  ;;  %v4374_v10 = vld [vmem:[#allocation3 + $0x408] ss:$16 sps:$4 sm:$0xff]   ;;  %v4377_v11 = vld [vmem:[#allocation3 + $0x3c0] ss:$16 sps:$4 sm:$0xff]  }
 0x3b9   :  { %2686 = vmatpush1.bf16.msra.mxu1 %v4302_v23  ;;  %3486 = vmatpush1.bf16.msra.mxu0 %v4305_v45  ;;  %v4382_v23 = vld [vmem:[#allocation3 + $0x42c] ss:$16 sps:$4 sm:$0xff]   ;;  %v1582_v45 = vadd.f32 %v5037_v32, %v1413_v9 }
 0x3ba   :  { %2687 = vmatprep.subr.bf16.mxu1 %v4310_v13  ;;  %3487 = vmatprep.subr.bf16.mxu0 %v4313_v14  ;;  %v4385_v13 = vld [vmem:[#allocation3 + $0x3e4] ss:$16 sps:$4 sm:$0xff]   ;;  %v4380_v14 = vld [vmem:[#allocation3 + $0x428] ss:$16 sps:$4 sm:$0xff]   ;;  %v4457_v9 = vld [vmem:[#allocation3 + $0x36c] ss:$16 sps:$4 sm:$0xff]  }
 0x3bd   :  { %2688 = vmatpush1.bf16.msra.mxu1 %v4308_v46  ;;  %3488 = vmatpush1.bf16.msra.mxu0 %v4311_v17  ;;  %v4383_v46 = vld [vmem:[#allocation3 + $0x3e0] ss:$16 sps:$4 sm:$0xff]   ;;  %v4388_v17 = vld [vmem:[#allocation3 + $0x44c] ss:$16 sps:$4 sm:$0xff]  }
 0x3be   :  { %2689 = vmatprep.subr.bf16.mxu1 %v4316_v19  ;;  %3489 = vmatprep.subr.bf16.mxu0 %v4319_v26  ;;  %v1590_v19 = vmax.f32 %v1582_v45, 0.0  ;;  %v4391_v26 = vld [vmem:[#allocation3 + $0x20c] ss:$16 sps:$4 sm:$0xff]   ;;  %v1409_v45 = vrot.slane %v5059_v63, %v5046_v35 }
 0x3c0   :  { %v5082_v32 = vpack.c.bf16 %v1590_v19, %v1590_v19  ;;  %v1543_v19 = vadd.f32 %v5035_v29, %v1409_v45  ;;  %v4481_v29 = vld [vmem:[#allocation3 + $0x3ec] ss:$16 sps:$4 sm:$0xff]  }
 0x3c1   :  { %2690 = vmatpush1.bf16.msra.mxu1 %v4314_v27  ;;  %3490 = vmatpush1.bf16.msra.mxu0 %v4317_v36  ;;  %v4386_v27 = vld [vmem:[#allocation3 + $0x448] ss:$16 sps:$4 sm:$0xff]   ;;  %v4538_v45 = vld [vmem:[#allocation3 + $0x8c] ss:$16 sps:$4 sm:$0xff]  }
 0x3c2   :  { %2691 = vmatprep.subr.bf16.mxu1 %v4322_v31  ;;  %3491 = vmatprep.subr.bf16.mxu0 %v4325_v28  ;;  %v4389_v36 = vld [vmem:[#allocation3 + $0x208] ss:$16 sps:$4 sm:$0xff]   ;;  %v4397_v31 = vld [vmem:[#allocation3 + $0x22c] ss:$16 sps:$4 sm:$0xff]  }
 0x3c3   :  { %v4395_v28 = vld [vmem:[#allocation3 + $0x228] ss:$16 sps:$4 sm:$0xff]  }
 0x3c5   :  { %2692 = vmatpush1.bf16.msra.mxu1 %v4320_v43  ;;  %3492 = vmatpush1.bf16.msra.mxu0 %v4323_v33  ;;  %v4400_v43 = vld [vmem:[#allocation3 + $0x48c] ss:$16 sps:$4 sm:$0xff]  }
 0x3c6   :  { %2693 = vmatprep.subr.bf16.mxu1 %v4328_v1  ;;  %3493 = vmatprep.subr.bf16.mxu0 %v4331_v37  ;;  %v4403_v33 = vld [vmem:[#allocation3 + $0x24c] ss:$16 sps:$4 sm:$0xff]   ;;  %v4398_v1 = vld [vmem:[#allocation3 + $0x488] ss:$16 sps:$4 sm:$0xff]  }
 0x3c7   :  { %v4401_v37 = vld [vmem:[#allocation3 + $0x248] ss:$16 sps:$4 sm:$0xff]  }
 0x3c9   :  { %2694 = vmatpush1.bf16.msra.mxu1 %v4326_v38  ;;  %3494 = vmatpush1.bf16.msra.mxu0 %v4329_v40  ;;  %v4406_v38 = vld [vmem:[#allocation3 + $0x4ac] ss:$16 sps:$4 sm:$0xff]  }
 0x3ca   :  { %2695 = vmatprep.subr.bf16.mxu1 %v4334_v47  ;;  %3495 = vmatprep.subr.bf16.mxu0 %v4337_v39  ;;  %v4409_v40 = vld [vmem:[#allocation3 + $0x26c] ss:$16 sps:$4 sm:$0xff]   ;;  %v4404_v47 = vld [vmem:[#allocation3 + $0x4a8] ss:$16 sps:$4 sm:$0xff]  }
 0x3cb   :  { %v4407_v39 = vld [vmem:[#allocation3 + $0x268] ss:$16 sps:$4 sm:$0xff]  }
 0x3cd   :  { %2696 = vmatpush1.bf16.msra.mxu1 %v4332_v51  ;;  %3496 = vmatpush1.bf16.msra.mxu0 %v4335_v5  ;;  %v4412_v51 = vld [vmem:[#allocation3 + $0x4cc] ss:$16 sps:$4 sm:$0xff]   ;;  %v4410_v5 = vld [vmem:[#allocation3 + $0x4c8] ss:$16 sps:$4 sm:$0xff]  }
 0x3ce   :  { %2697 = vmatprep.subr.bf16.mxu1 %v4340_v52  ;;  %3497 = vmatprep.subr.bf16.mxu0 %v4343_v3  ;;  %v4413_v52 = vld [vmem:[#allocation3 + $0x288] ss:$16 sps:$4 sm:$0xff]   ;;  %v4418_v3 = vld [vmem:[#allocation3 + $0x4ec] ss:$16 sps:$4 sm:$0xff]  }
 0x3d1   :  { %2698 = vmatpush1.bf16.msra.mxu1 %v4338_v50  ;;  %3498 = vmatpush1.bf16.msra.mxu0 %v4341_v48  ;;  %v4421_v50 = vld [vmem:[#allocation3 + $0x2ac] ss:$16 sps:$4 sm:$0xff]   ;;  %v4416_v48 = vld [vmem:[#allocation3 + $0x4e8] ss:$16 sps:$4 sm:$0xff]  }
 0x3d2   :  { %2699 = vmatprep.subr.bf16.mxu1 %v4346_v25  ;;  %3499 = vmatprep.subr.bf16.mxu0 %v4349_v8  ;;  %v4419_v25 = vld [vmem:[#allocation3 + $0x2a8] ss:$16 sps:$4 sm:$0xff]   ;;  %v4424_v8 = vld [vmem:[#allocation3 + $0x50c] ss:$16 sps:$4 sm:$0xff]  }
 0x3d5   :  { %2700 = vmatpush1.bf16.msra.mxu1 %v4344_v30  ;;  %3500 = vmatpush1.bf16.msra.mxu0 %v4347_v54  ;;  %v4427_v30 = vld [vmem:[#allocation3 + $0x2cc] ss:$16 sps:$4 sm:$0xff]   ;;  %v4422_v54 = vld [vmem:[#allocation3 + $0x508] ss:$16 sps:$4 sm:$0xff]  }
 0x3d6   :  { %2701 = vmatprep.subr.bf16.mxu1 %v4352_v55  ;;  %3501 = vmatprep.subr.bf16.mxu0 %v4355_v6  ;;  %v4425_v55 = vld [vmem:[#allocation3 + $0x2c8] ss:$16 sps:$4 sm:$0xff]   ;;  %v4430_v6 = vld [vmem:[#allocation3 + $0x52c] ss:$16 sps:$4 sm:$0xff]  }
 0x3d9   :  { %2702 = vmatpush1.bf16.msra.mxu1 %v4350_v12  ;;  %3502 = vmatpush1.bf16.msra.mxu0 %v4353_v16  ;;  %v4433_v12 = vld [vmem:[#allocation3 + $0x2ec] ss:$16 sps:$4 sm:$0xff]   ;;  %v4428_v16 = vld [vmem:[#allocation3 + $0x528] ss:$16 sps:$4 sm:$0xff]  }
 0x3da   :  { %2703 = vmatprep.subr.bf16.mxu1 %v4358_v18  ;;  %3503 = vmatprep.subr.bf16.mxu0 %v4361_v20  ;;  %v4431_v18 = vld [vmem:[#allocation3 + $0x2e8] ss:$16 sps:$4 sm:$0xff]   ;;  %v4436_v20 = vld [vmem:[#allocation3 + $0x54c] ss:$16 sps:$4 sm:$0xff]  }
 0x3dd   :  { %2704 = vmatpush1.bf16.msra.mxu1 %v4356_v41  ;;  %3504 = vmatpush1.bf16.msra.mxu0 %v4359_v49  ;;  %v4439_v41 = vld [vmem:[#allocation3 + $0x30c] ss:$16 sps:$4 sm:$0xff]   ;;  %v4434_v49 = vld [vmem:[#allocation3 + $0x548] ss:$16 sps:$4 sm:$0xff]  }
 0x3de   :  { %2705 = vmatprep.subr.bf16.mxu1 %v4364_v53  ;;  %3505 = vmatprep.subr.bf16.mxu0 %v4367_v15  ;;  %v4437_v53 = vld [vmem:[#allocation3 + $0x308] ss:$16 sps:$4 sm:$0xff]   ;;  %v4442_v15 = vld [vmem:[#allocation3 + $0x56c] ss:$16 sps:$4 sm:$0xff]  }
 0x3e1   :  { %2706 = vmatpush1.bf16.msra.mxu1 %v4362_v56  ;;  %3506 = vmatpush1.bf16.msra.mxu0 %v4365_v57  ;;  %v4445_v56 = vld [vmem:[#allocation3 + $0x32c] ss:$16 sps:$4 sm:$0xff]   ;;  %v4440_v57 = vld [vmem:[#allocation3 + $0x568] ss:$16 sps:$4 sm:$0xff]  }
 0x3e2   :  { %2707 = vmatprep.subr.bf16.mxu1 %v4370_v24  ;;  %3507 = vmatprep.subr.bf16.mxu0 %v4373_v59  ;;  %v4443_v24 = vld [vmem:[#allocation3 + $0x328] ss:$16 sps:$4 sm:$0xff]   ;;  %v4448_v59 = vld [vmem:[#allocation3 + $0x58c] ss:$16 sps:$4 sm:$0xff]  }
 0x3e5   :  { %2708 = vmatpush1.bf16.msra.mxu1 %v4368_v60  ;;  %3508 = vmatpush1.bf16.msra.mxu0 %v4371_v61  ;;  %v4451_v60 = vld [vmem:[#allocation3 + $0x34c] ss:$16 sps:$4 sm:$0xff]   ;;  %v4446_v61 = vld [vmem:[#allocation3 + $0x588] ss:$16 sps:$4 sm:$0xff]  }
 0x3e6   :  { %2718 = vmatprep.subr.bf16.mxu1 %v4376_v0  ;;  %3509 = vmatprep.subr.bf16.mxu0 %v4379_v22  ;;  %v4449_v0 = vld [vmem:[#allocation3 + $0x348] ss:$16 sps:$4 sm:$0xff]   ;;  %v4454_v22 = vld [vmem:[#allocation3 + $0x5ac] ss:$16 sps:$4 sm:$0xff]  }
 0x3e8   :  { %2710 = vmatmul.mubr.bf16.vlgmr.msra.gmra.mrb[88].mxu1 %v5071_v58  ;;  %v4394_v58 = vld [vmem:[#allocation3 + $0x46c] ss:$16 sps:$4 sm:$0xff]  }
 0x3e9   :  { %2719 = vmatpush1.bf16.msra.mxu1 %v4374_v10  ;;  %2750 = vmatprep.mubr.bf16.mxu1 %v5064_v7  ;;  %v4392_v7 = vld [vmem:[#allocation3 + $0x468] ss:$16 sps:$4 sm:$0xff]  }
 0x3ea   :  { %3510 = vmatpush1.bf16.msra.mxu0 %v4377_v11  ;;  %2720 = vmatprep.subr.bf16.mxu1 %v4382_v23  ;;  %v4452_v10 = vld [vmem:[#allocation3 + $0x5a8] ss:$16 sps:$4 sm:$0xff]   ;;  %v4460_v23 = vld [vmem:[#allocation3 + $0x5cc] ss:$16 sps:$4 sm:$0xff]  }
 0x3eb   :  { %3511 = vmatprep.subr.bf16.mxu0 %v4385_v13  ;;  %v4455_v11 = vld [vmem:[#allocation3 + $0x368] ss:$16 sps:$4 sm:$0xff]   ;;  %v4463_v13 = vld [vmem:[#allocation3 + $0x38c] ss:$16 sps:$4 sm:$0xff]  }
 0x3ed   :  { %2721 = vmatpush1.bf16.msra.mxu1 %v4380_v14  ;;  %v4458_v14 = vld [vmem:[#allocation3 + $0x5c8] ss:$16 sps:$4 sm:$0xff]  }
 0x3ee   :  { %3512 = vmatpush1.bf16.msra.mxu0 %v4383_v46  ;;  %2722 = vmatprep.subr.bf16.mxu1 %v4388_v17  ;;  %v4461_v46 = vld [vmem:[#allocation3 + $0x388] ss:$16 sps:$4 sm:$0xff]   ;;  %v4466_v17 = vld [vmem:[#allocation3 + $0x5ec] ss:$16 sps:$4 sm:$0xff]  }
 0x3ef   :  { %3563 = vmatprep.subr.bf16.mxu0 %v4391_v26  ;;  %v4469_v26 = vld [vmem:[#allocation3 + $0x3ac] ss:$16 sps:$4 sm:$0xff]  }
 0x3f1   :  { %3514 = vmatmul.mubr.bf16.vlgmr.msra.gmra.mrb[72].mxu0 %v5082_v32  ;;  %2723 = vmatpush1.bf16.msra.mxu1 %v4386_v27  ;;  %v4464_v27 = vld [vmem:[#allocation3 + $0x5e8] ss:$16 sps:$4 sm:$0xff]  }
 0x3f2   :  { %3564 = vmatpush1.bf16.msra.mxu0 %v4389_v36  ;;  %3595 = vmatprep.mubr.bf16.mxu0 %v5073_v2  ;;  %v4415_v2 = vld [vmem:[#allocation3 + $0x28c] ss:$16 sps:$4 sm:$0xff]   ;;  %v4467_v36 = vld [vmem:[#allocation3 + $0x3a8] ss:$16 sps:$4 sm:$0xff]  }
 0x3f3   :  { %2724 = vmatprep.subr.bf16.mxu1 %v4394_v58  ;;  %3565 = vmatprep.subr.bf16.mxu0 %v4397_v31  ;;  %v4472_v58 = vld [vmem:[#allocation3 + $0x4] ss:$16 sps:$4 sm:$0xff]   ;;  %v1589_v31 = vmax.f32 %v1543_v19, 0.0 }
 0x3f5   :  { %2725 = vmatpush1.bf16.msra.mxu1 %v4392_v7  ;;  %v4475_v7 = vld [vmem:[#allocation3 + $0x3cc] ss:$16 sps:$4 sm:$0xff]  }
 0x3f6   :  { %3566 = vmatpush1.bf16.msra.mxu0 %v4395_v28  ;;  %2726 = vmatprep.subr.bf16.mxu1 %v4400_v43  ;;  %v4470_v28 = vld [vmem:[#allocation3] ss:$16 sps:$4 sm:$0xff]   ;;  %v4473_v43 = vld [vmem:[#allocation3 + $0x3c8] ss:$16 sps:$4 sm:$0xff]  }
 0x3f7   :  { %3567 = vmatprep.subr.bf16.mxu0 %v4403_v33  ;;  %v4478_v33 = vld [vmem:[#allocation3 + $0x24] ss:$16 sps:$4 sm:$0xff]  }
 0x3f9   :  { %2727 = vmatpush1.bf16.msra.mxu1 %v4398_v1  ;;  %v5089_v1 = vpack.c.bf16 %v1589_v31, %v1589_v31  ;;  %v4547_v31 = vld [vmem:[#allocation3 + $0xec] ss:$16 sps:$4 sm:$0xff]  }
 0x3fa   :  { %3568 = vmatpush1.bf16.msra.mxu0 %v4401_v37  ;;  %2728 = vmatprep.subr.bf16.mxu1 %v4406_v38  ;;  %v4476_v37 = vld [vmem:[#allocation3 + $0x20] ss:$16 sps:$4 sm:$0xff]   ;;  %v4479_v38 = vld [vmem:[#allocation3 + $0x3e8] ss:$16 sps:$4 sm:$0xff]  }
 0x3fb   :  { %3569 = vmatprep.subr.bf16.mxu0 %v4409_v40  ;;  %v4484_v40 = vld [vmem:[#allocation3 + $0x44] ss:$16 sps:$4 sm:$0xff]  }
 0x3fd   :  { %2729 = vmatpush1.bf16.msra.mxu1 %v4404_v47  ;;  %v4482_v47 = vld [vmem:[#allocation3 + $0x40] ss:$16 sps:$4 sm:$0xff]  }
 0x3fe   :  { %3570 = vmatpush1.bf16.msra.mxu0 %v4407_v39  ;;  %2730 = vmatprep.subr.bf16.mxu1 %v4412_v51  ;;  %v4487_v39 = vld [vmem:[#allocation3 + $0x64] ss:$16 sps:$4 sm:$0xff]   ;;  %v4485_v51 = vld [vmem:[#allocation3 + $0x60] ss:$16 sps:$4 sm:$0xff]  }
 0x3ff   :  { %3571 = vmatprep.subr.bf16.mxu0 %v4415_v2  ;;  %v4488_v2 = vld [vmem:[#allocation3 + $0x80] ss:$16 sps:$4 sm:$0xff]  }
 0x401   :  { %2731 = vmatpush1.bf16.msra.mxu1 %v4410_v5  ;;  %v4493_v5 = vld [vmem:[#allocation3 + $0xa4] ss:$16 sps:$4 sm:$0xff]  }
 0x402   :  { %3572 = vmatpush1.bf16.msra.mxu0 %v4413_v52  ;;  %2732 = vmatprep.subr.bf16.mxu1 %v4418_v3  ;;  %v4491_v52 = vld [vmem:[#allocation3 + $0xa0] ss:$16 sps:$4 sm:$0xff]   ;;  %v4496_v3 = vld [vmem:[#allocation3 + $0xc4] ss:$16 sps:$4 sm:$0xff]  }
 0x403   :  { %3573 = vmatprep.subr.bf16.mxu0 %v4421_v50  ;;  %v4494_v50 = vld [vmem:[#allocation3 + $0xc0] ss:$16 sps:$4 sm:$0xff]  }
 0x405   :  { %2733 = vmatpush1.bf16.msra.mxu1 %v4416_v48  ;;  %v4499_v48 = vld [vmem:[#allocation3 + $0xe4] ss:$16 sps:$4 sm:$0xff]  }
 0x406   :  { %3574 = vmatpush1.bf16.msra.mxu0 %v4419_v25  ;;  %2734 = vmatprep.subr.bf16.mxu1 %v4424_v8  ;;  %v4497_v25 = vld [vmem:[#allocation3 + $0xe0] ss:$16 sps:$4 sm:$0xff]  }
 0x407   :  { %3575 = vmatprep.subr.bf16.mxu0 %v4427_v30  ;;  %v4500_v8 = vld [vmem:[#allocation3 + $0x100] ss:$16 sps:$4 sm:$0xff]   ;;  %v4505_v30 = vld [vmem:[#allocation3 + $0x124] ss:$16 sps:$4 sm:$0xff]  }
 0x409   :  { %2735 = vmatpush1.bf16.msra.mxu1 %v4422_v54  ;;  %v4503_v54 = vld [vmem:[#allocation3 + $0x120] ss:$16 sps:$4 sm:$0xff]  }
 0x40a   :  { %3576 = vmatpush1.bf16.msra.mxu0 %v4425_v55  ;;  %2736 = vmatprep.subr.bf16.mxu1 %v4430_v6  ;;  %v4508_v55 = vld [vmem:[#allocation3 + $0x144] ss:$16 sps:$4 sm:$0xff]   ;;  %v4506_v6 = vld [vmem:[#allocation3 + $0x140] ss:$16 sps:$4 sm:$0xff]  }
 0x40b   :  { %3577 = vmatprep.subr.bf16.mxu0 %v4433_v12  ;;  %v4511_v12 = vld [vmem:[#allocation3 + $0x164] ss:$16 sps:$4 sm:$0xff]  }
 0x40d   :  { %2737 = vmatpush1.bf16.msra.mxu1 %v4428_v16  ;;  %v4509_v16 = vld [vmem:[#allocation3 + $0x160] ss:$16 sps:$4 sm:$0xff]  }
 0x40e   :  { %3578 = vmatpush1.bf16.msra.mxu0 %v4431_v18  ;;  %2738 = vmatprep.subr.bf16.mxu1 %v4436_v20  ;;  %v4514_v18 = vld [vmem:[#allocation3 + $0x184] ss:$16 sps:$4 sm:$0xff]   ;;  %v4512_v20 = vld [vmem:[#allocation3 + $0x180] ss:$16 sps:$4 sm:$0xff]  }
 0x40f   :  { %3579 = vmatprep.subr.bf16.mxu0 %v4439_v41  ;;  %v4517_v41 = vld [vmem:[#allocation3 + $0x1a4] ss:$16 sps:$4 sm:$0xff]  }
 0x411   :  { %2739 = vmatpush1.bf16.msra.mxu1 %v4434_v49  ;;  %v4515_v49 = vld [vmem:[#allocation3 + $0x1a0] ss:$16 sps:$4 sm:$0xff]  }
 0x412   :  { %3580 = vmatpush1.bf16.msra.mxu0 %v4437_v53  ;;  %2740 = vmatprep.subr.bf16.mxu1 %v4442_v15  ;;  %v1405_v53 = vrot.slane %v5059_v63, %v5043_v34  ;;  %v4520_v15 = vld [vmem:[#allocation3 + $0x1c4] ss:$16 sps:$4 sm:$0xff]   ;;  %v4527_v63 = vld [vmem:[#allocation3 + $0x28] ss:$16 sps:$4 sm:$0xff]  }
 0x413   :  { %3581 = vmatprep.subr.bf16.mxu0 %v4445_v56  ;;  %v4518_v56 = vld [vmem:[#allocation3 + $0x1c0] ss:$16 sps:$4 sm:$0xff]  }
 0x415   :  { %2741 = vmatpush1.bf16.msra.mxu1 %v4440_v57  ;;  %v1541_v57 = vadd.f32 %v5033_v62, %v1405_v53  ;;  %v4532_v62 = vld [vmem:[#allocation3 + $0x4c] ss:$16 sps:$4 sm:$0xff]   ;;  %v4601_v53 = vmov 1966171168  }
 0x416   :  { %3582 = vmatpush1.bf16.msra.mxu0 %v4443_v24  ;;  %2742 = vmatprep.subr.bf16.mxu1 %v4448_v59  ;;  %v4523_v24 = vld [vmem:[#allocation3 + $0x1e4] ss:$16 sps:$4 sm:$0xff]   ;;  %v4521_v59 = vld [vmem:[#allocation3 + $0x1e0] ss:$16 sps:$4 sm:$0xff]  }
 0x417   :  { %3583 = vmatprep.subr.bf16.mxu0 %v4451_v60  ;;  %v1588_v60 = vmax.f32 %v1541_v57, 0.0 }
 0x419   :  { %2743 = vmatpush1.bf16.msra.mxu1 %v4446_v61  ;;  %v4526_v61 = vld [vmem:[#allocation3 + $0xc] ss:$16 sps:$4 sm:$0xff]  }
 0x41a   :  { %3584 = vmatpush1.bf16.msra.mxu0 %v4449_v0  ;;  %2744 = vmatprep.subr.bf16.mxu1 %v4454_v22  ;;  %v4524_v0 = vld [vmem:[#allocation3 + $0x8] ss:$16 sps:$4 sm:$0xff]   ;;  %v5097_v22 = vpack.c.bf16 %v1588_v60, %v1588_v60 }
 0x41b   :  { %3585 = vmatprep.subr.bf16.mxu0 %v4457_v9  ;;  %v4529_v9 = vld [vmem:[#allocation3 + $0x2c] ss:$16 sps:$4 sm:$0xff]  }
 0x41d   :  { %2745 = vmatpush1.bf16.msra.mxu1 %v4452_v10  ;;  %v4530_v10 = vld [vmem:[#allocation3 + $0x48] ss:$16 sps:$4 sm:$0xff]  }
 0x41e   :  { %3586 = vmatpush1.bf16.msra.mxu0 %v4455_v11  ;;  %2746 = vmatprep.subr.bf16.mxu1 %v4460_v23  ;;  %v4535_v11 = vld [vmem:[#allocation3 + $0x6c] ss:$16 sps:$4 sm:$0xff]   ;;  %v4533_v23 = vld [vmem:[#allocation3 + $0x68] ss:$16 sps:$4 sm:$0xff]  }
 0x41f   :  { %3587 = vmatprep.subr.bf16.mxu0 %v4463_v13  ;;  %v4536_v13 = vld [vmem:[#allocation3 + $0x88] ss:$16 sps:$4 sm:$0xff]  }
 0x421   :  { %2747 = vmatpush1.bf16.msra.mxu1 %v4458_v14  ;;  %v4541_v14 = vld [vmem:[#allocation3 + $0xac] ss:$16 sps:$4 sm:$0xff]  }
 0x422   :  { %3588 = vmatpush1.bf16.msra.mxu0 %v4461_v46  ;;  %2748 = vmatprep.subr.bf16.mxu1 %v4466_v17  ;;  %v4539_v46 = vld [vmem:[#allocation3 + $0xa8] ss:$16 sps:$4 sm:$0xff]   ;;  %v4544_v17 = vld [vmem:[#allocation3 + $0xcc] ss:$16 sps:$4 sm:$0xff]  }
 0x423   :  { %3589 = vmatprep.subr.bf16.mxu0 %v4469_v26 }
 0x425   :  { %2749 = vmatpush1.bf16.msra.mxu1 %v4464_v27 }
 0x426   :  { %3590 = vmatpush1.bf16.msra.mxu0 %v4467_v36  ;;  %3440 = vmatprep.subr.bf16.mxu1 %v4472_v58  ;;  %v4542_v36 = vld [vmem:[#allocation3 + $0xc8] ss:$16 sps:$4 sm:$0xff]  }
 0x427   :  { %3591 = vmatprep.subr.bf16.mxu0 %v4475_v7  ;;  %v4545_v7 = vld [vmem:[#allocation3 + $0xe8] ss:$16 sps:$4 sm:$0xff]  }
 0x428   :  { %2751 = vmatmul.mubr.bf16.vlgmr.msra.gmra.mrb[92].mxu1 %v5067_v42  ;;  %v4490_v42 = vld [vmem:[#allocation3 + $0x84] ss:$16 sps:$4 sm:$0xff]  }
 0x429   :  { %3441 = vmatpush1.bf16.msra.mxu1 %v4470_v28  ;;  %3472 = vmatprep.mubr.bf16.mxu1 %v5089_v1  ;;  %v4550_v28 = vld [vmem:[#allocation3 + $0x10c] ss:$16 sps:$4 sm:$0xff]  }
 0x42a   :  { %3592 = vmatpush1.bf16.msra.mxu0 %v4473_v43  ;;  %3442 = vmatprep.subr.bf16.mxu1 %v4478_v33 }
 0x42b   :  { %3593 = vmatprep.subr.bf16.mxu0 %v4481_v29 }
 0x42d   :  { %3443 = vmatpush1.bf16.msra.mxu1 %v4476_v37  ;;  %v4553_v37 = vld [vmem:[#allocation3 + $0x12c] ss:$16 sps:$4 sm:$0xff]  }
 0x42e   :  { %3594 = vmatpush1.bf16.msra.mxu0 %v4479_v38  ;;  %3444 = vmatprep.subr.bf16.mxu1 %v4484_v40  ;;  %v4551_v40 = vld [vmem:[#allocation3 + $0x128] ss:$16 sps:$4 sm:$0xff]  }
 0x431   :  { %3596 = vmatmul.mubr.bf16.vlgmr.msra.gmra.mrb[76].mxu0 %v5082_v32  ;;  %3445 = vmatpush1.bf16.msra.mxu1 %v4482_v47  ;;  %v4502_v32 = vld [vmem:[#allocation3 + $0x104] ss:$16 sps:$4 sm:$0xff]   ;;  %v4556_v47 = vld [vmem:[#allocation3 + $0x14c] ss:$16 sps:$4 sm:$0xff]  }
 0x432   :  { %3446 = vmatprep.subr.bf16.mxu1 %v4487_v39  ;;  %v4554_v39 = vld [vmem:[#allocation3 + $0x148] ss:$16 sps:$4 sm:$0xff]  }
 0x435   :  { %3447 = vmatpush1.bf16.msra.mxu1 %v4485_v51  ;;  %v4559_v51 = vld [vmem:[#allocation3 + $0x16c] ss:$16 sps:$4 sm:$0xff]  }
 0x436   :  { %3448 = vmatprep.subr.bf16.mxu1 %v4490_v42  ;;  %v4557_v42 = vld [vmem:[#allocation3 + $0x168] ss:$16 sps:$4 sm:$0xff]  }
 0x439   :  { %3449 = vmatpush1.bf16.msra.mxu1 %v4488_v2  ;;  %v4562_v2 = vld [vmem:[#allocation3 + $0x18c] ss:$16 sps:$4 sm:$0xff]  }
 0x43a   :  { %3450 = vmatprep.subr.bf16.mxu1 %v4493_v5  ;;  %v4560_v5 = vld [vmem:[#allocation3 + $0x188] ss:$16 sps:$4 sm:$0xff]  }
 0x43d   :  { %3451 = vmatpush1.bf16.msra.mxu1 %v4491_v52  ;;  %v4565_v52 = vld [vmem:[#allocation3 + $0x1ac] ss:$16 sps:$4 sm:$0xff]  }
 0x43e   :  { %3452 = vmatprep.subr.bf16.mxu1 %v4496_v3  ;;  %v4563_v3 = vld [vmem:[#allocation3 + $0x1a8] ss:$16 sps:$4 sm:$0xff]  }
 0x441   :  { %3453 = vmatpush1.bf16.msra.mxu1 %v4494_v50  ;;  %v4568_v50 = vld [vmem:[#allocation3 + $0x1cc] ss:$16 sps:$4 sm:$0xff]  }
 0x442   :  { %3454 = vmatprep.subr.bf16.mxu1 %v4499_v48  ;;  %v4566_v48 = vld [vmem:[#allocation3 + $0x1c8] ss:$16 sps:$4 sm:$0xff]  }
 0x445   :  { %3455 = vmatpush1.bf16.msra.mxu1 %v4497_v25  ;;  %v4571_v25 = vld [vmem:[#allocation3 + $0x1ec] ss:$16 sps:$4 sm:$0xff]  }
 0x446   :  { %3456 = vmatprep.subr.bf16.mxu1 %v4502_v32  ;;  %v4569_v32 = vld [vmem:[#allocation3 + $0x1e8] ss:$16 sps:$4 sm:$0xff]  }
 0x449   :  { %3457 = vmatpush1.bf16.msra.mxu1 %v4500_v8 }
 0x44a   :  { %3458 = vmatprep.subr.bf16.mxu1 %v4505_v30 }
 0x44d   :  { %3459 = vmatpush1.bf16.msra.mxu1 %v4503_v54 }
 0x44e   :  { %3460 = vmatprep.subr.bf16.mxu1 %v4508_v55 }
 0x451   :  { %3461 = vmatpush1.bf16.msra.mxu1 %v4506_v6 }
 0x452   :  { %3462 = vmatprep.subr.bf16.mxu1 %v4511_v12 }
 0x455   :  { %3463 = vmatpush1.bf16.msra.mxu1 %v4509_v16 }
 0x456   :  { %3464 = vmatprep.subr.bf16.mxu1 %v4514_v18 }
 0x459   :  { %3465 = vmatpush1.bf16.msra.mxu1 %v4512_v20 }
 0x45a   :  { %3466 = vmatprep.subr.bf16.mxu1 %v4517_v41 }
 0x45d   :  { %3467 = vmatpush1.bf16.msra.mxu1 %v4515_v49 }
 0x45e   :  { %3468 = vmatprep.subr.bf16.mxu1 %v4520_v15  ;;  %v3651_v15 = vunpack.c.l.s4 %v4601_v53 }
 0x460   :  { %v3652_v60 = vunpack.c.0.s8 %v3651_v15 }
 0x461   :  { %3469 = vmatpush1.bf16.msra.mxu1 %v4518_v56 }
 0x462   :  { %3470 = vmatprep.subr.bf16.mxu1 %v4523_v24 }
 0x465   :  { %3471 = vmatpush1.bf16.msra.mxu1 %v4521_v59 }
 0x466   :  { %3522 = vmatprep.subr.bf16.mxu1 %v4526_v61 }
 0x468   :  { %3473 = vmatmul.mubr.bf16.vlgmr.msra.gmra.mrb[96].mxu1 %v5097_v22 }
 0x469   :  { %3523 = vmatpush1.bf16.msra.mxu1 %v4524_v0  ;;  %3554 = vmatprep.mubr.bf16.mxu1 %v5089_v1  ;;  %v4548_v1 = vld [vmem:[#allocation3 + $0x108] ss:$16 sps:$4 sm:$0xff]   ;;  %v4099_v0 = vld.sshfl [vmem:[%s5129_s10] sm:$0x33 pattern:$0x75316420] }
 0x46a   :  { %3524 = vmatprep.subr.bf16.mxu1 %v4529_v9  ;;  %v3655_v9 = vsub.s32 %v3652_v60, %v4681_v4 }
 0x46d   :  { %3525 = vmatpush1.bf16.msra.mxu1 %v4527_v63 }
 0x46e   :  { %3526 = vmatprep.subr.bf16.mxu1 %v4532_v62  ;;  %v3656_v62 = vrot.slane %v4099_v0, %v3655_v9 }
 0x471   :  { %3527 = vmatpush1.bf16.msra.mxu1 %v4530_v10 }
 0x472   :  { %3528 = vmatprep.subr.bf16.mxu1 %v4535_v11 }
 0x475   :  { %3529 = vmatpush1.bf16.msra.mxu1 %v4533_v23 }
 0x476   :  { %3530 = vmatprep.subr.bf16.mxu1 %v4538_v45 }
 0x479   :  { %3531 = vmatpush1.bf16.msra.mxu1 %v4536_v13  ;;  %v3604_v13 = vld [vmem:[%s5128_s9] sm:$0xf] }
 0x47a   :  { %3532 = vmatprep.subr.bf16.mxu1 %v4541_v14 }
 0x47b   :  { %v2670_v19 = vpop.f32.mrb[84].mxu1 }
 0x47c   :  { %v2672_v26 = vpop.f32.mrb[85].mxu1 }
 0x47d   :  { %3533 = vmatpush1.bf16.msra.mxu1 %v4539_v46  ;;  %v2674_v27 = vpop.f32.mrb[86].mxu1 }
 0x47e   :  { %v2675_v58 = vpop.f32.mrb[87].mxu1  ;;  %3534 = vmatprep.subr.bf16.mxu1 %v4544_v17  ;;  %v3609_v17 = vrot.slane %v3604_v13, %v5043_v34  ;;  %v3613_v27 = vrot.slane %v3604_v13, %v5046_v35 }
 0x481   :  { %3535 = vmatpush1.bf16.msra.mxu1 %v4542_v36 }
 0x482   :  { %3536 = vmatprep.subr.bf16.mxu1 %v4547_v31 }
 0x483   :  { %v2793_v43 = vpop.f32.mrb[68].mxu0 }
 0x484   :  { %v2795_v33 = vpop.f32.mrb[69].mxu0 }
 0x485   :  { %3537 = vmatpush1.bf16.msra.mxu1 %v4545_v7  ;;  %v2797_v29 = vpop.f32.mrb[70].mxu0 }
 0x486   :  { %3538 = vmatprep.subr.bf16.mxu1 %v4550_v28  ;;  %v2798_v38 = vpop.f32.mrb[71].mxu0 }
 0x489   :  { %3539 = vmatpush1.bf16.msra.mxu1 %v4548_v1 }
 0x48a   :  { %3540 = vmatprep.subr.bf16.mxu1 %v4553_v37 }
 0x48d   :  { %3541 = vmatpush1.bf16.msra.mxu1 %v4551_v40  ;;  %v3617_v40 = vrot.slane %v3604_v13, %v5054_v21  ;;  %v3640_v21 = vstv %s5130_s11 }
 0x48e   :  { %3542 = vmatprep.subr.bf16.mxu1 %v4556_v47 }
 0x491   :  { %3543 = vmatpush1.bf16.msra.mxu1 %v4554_v39  ;;  %v3621_v39 = vrot.slane %v3604_v13, %v5051_v44 }
 0x492   :  { %3544 = vmatprep.subr.bf16.mxu1 %v4559_v51 }
 0x495   :  { %3545 = vmatpush1.bf16.msra.mxu1 %v4557_v42 }
 0x496   :  { %3546 = vmatprep.subr.bf16.mxu1 %v4562_v2 }
 0x499   :  { %3547 = vmatpush1.bf16.msra.mxu1 %v4560_v5 }
 0x49a   :  { %3548 = vmatprep.subr.bf16.mxu1 %v4565_v52 }
 0x49d   :  { %3549 = vmatpush1.bf16.msra.mxu1 %v4563_v3 }
 0x49e   :  { %3550 = vmatprep.subr.bf16.mxu1 %v4568_v50 }
 0x4a1   :  { %3551 = vmatpush1.bf16.msra.mxu1 %v4566_v48 }
 0x4a2   :  { %3552 = vmatprep.subr.bf16.mxu1 %v4571_v25 }
 0x4a5   :  { %3553 = vmatpush1.bf16.msra.mxu1 %v4569_v32 }
 0x4a8   :  { %3555 = vmatmul.mubr.bf16.vlgmr.msra.gmra.mrb[100].mxu1 %v5097_v22  ;;  %v3649_v22 = vcombine.high %v4099_v0, %v4099_v0 }
 0x4aa   :  { %v3663_v63 = vrot.slane %v3649_v22, %v3655_v9 }
 0x4ac   :  { %3702 = vmatprep.mubr.bf16.mxu1 %v3663_v63  ;;  %v3665_v37 = vcombine.high %v3663_v63, %v3663_v63 }
 0x4bb   :  { %v2711_v8 = vpop.f32.mrb[88].mxu1 }
 0x4bc   :  { %v2712_v30 = vadd.f32 %v2711_v8, %v2670_v19  ;;  %v2713_v54 = vpop.f32.mrb[89].mxu1  ;;  %v3664_v8 = vcombine.high %v3656_v62, %v3656_v62 }
 0x4bd   :  { %v2714_v55 = vadd.f32 %v2713_v54, %v2672_v26  ;;  %v2715_v6 = vpop.f32.mrb[90].mxu1 }
 0x4be   :  { %v2716_v12 = vpop.f32.mrb[91].mxu1 }
 0x4c4   :  { %v3515_v16 = vpop.f32.mrb[72].mxu0 }
 0x4c5   :  { %v3517_v18 = vpop.f32.mrb[73].mxu0 }
 0x4c6   :  { %v3519_v20 = vpop.f32.mrb[74].mxu0 }
 0x4c7   :  { %v3520_v41 = vpop.f32.mrb[75].mxu0 }
 0x4fb   :  { %v2752_v49 = vpop.f32.mrb[92].mxu1 }
 0x4fc   :  { %v2794_v56 = vadd.f32 %v2793_v43, %v2752_v49  ;;  %v2754_v57 = vpop.f32.mrb[93].mxu1 }
 0x4fd   :  { %v2796_v24 = vadd.f32 %v2795_v33, %v2754_v57  ;;  %v2756_v59 = vpop.f32.mrb[94].mxu1 }
 0x4fe   :  { %v2757_v61 = vpop.f32.mrb[95].mxu1 }
 0x504   :  { %v3597_v10 = vpop.f32.mrb[76].mxu0 }
 0x505   :  { %v3599_v11 = vpop.f32.mrb[77].mxu0 }
 0x506   :  { %v3601_v23 = vpop.f32.mrb[78].mxu0 }
 0x507   :  { %v3602_v45 = vpop.f32.mrb[79].mxu0 }
 0x53b   :  { %v3474_v14 = vpop.f32.mrb[96].mxu1 }
 0x53c   :  { %v3475_v46 = vadd.f32 %v3474_v14, %v2712_v30  ;;  %v3476_v19 = vpop.f32.mrb[97].mxu1 }
 0x53d   :  { %v3477_v26 = vadd.f32 %v3476_v19, %v2714_v55  ;;  %v3478_v4 = vpop.f32.mrb[98].mxu1 }
 0x53e   :  { %v3516_v36 = vadd.f32 %v3515_v16, %v3475_v46  ;;  %v3479_v58 = vpop.f32.mrb[99].mxu1 }
 0x53f   :  { %v3518_v31 = vadd.f32 %v3517_v18, %v3477_v26 }
 0x540   :  { %v3626_v7 = vadd.f32 %v3609_v17, %v3516_v36 }
 0x541   :  { %v3627_v28 = vadd.f32 %v3613_v27, %v3518_v31 }
 0x542   :  { %v3630_v43 = vmax.f32 %v3626_v7, 0.0 }
 0x543   :  { %v3631_v33 = vmax.f32 %v3627_v28, 0.0 }
 0x544   :  { %v3635_v29 = vpack.c.bf16 %v3630_v43, %v3630_v43 }
 0x545   :  { %v3636_v1 = vpack.c.bf16 %v3631_v33, %v3631_v33 }
 0x547   :  { %3670 = vmatprep.subr.bf16.mxu1 %v3636_v1 }
 0x548   :  { %3671 = vmatpush1.bf16.xpose.msra.mxu1 %v3635_v29 }
 0x54f   :  { %3703 = vmatmul.mubr.bf16.vlgmr.msra.gmra.mrb[104].mxu1 %v3656_v62 }
 0x550   :  { %3742 = vmatprep.mubr.bf16.mxu1 %v3665_v37 }
 0x57b   :  { %v3556_v34 = vpop.f32.mrb[100].mxu1 }
 0x57c   :  { %v3557_v38 = vadd.f32 %v3556_v34, %v2794_v56  ;;  %v3558_v35 = vpop.f32.mrb[101].mxu1 }
 0x57d   :  { %v3559_v47 = vadd.f32 %v3558_v35, %v2796_v24  ;;  %v3560_v51 = vpop.f32.mrb[102].mxu1 }
 0x57e   :  { %v3598_v42 = vadd.f32 %v3597_v10, %v3557_v38  ;;  %v3561_v2 = vpop.f32.mrb[103].mxu1 }
 0x57f   :  { %v3600_v5 = vadd.f32 %v3599_v11, %v3559_v47 }
 0x580   :  { %v3628_v52 = vadd.f32 %v3617_v40, %v3598_v42 }
 0x581   :  { %v3629_v3 = vadd.f32 %v3621_v39, %v3600_v5 }
 0x582   :  { %v3632_v50 = vmax.f32 %v3628_v52, 0.0 }
 0x583   :  { %v3633_v48 = vmax.f32 %v3629_v3, 0.0 }
 0x584   :  { %v3637_v32 = vpack.c.bf16 %v3632_v50, %v3632_v50 }
 0x585   :  { %v3638_v25 = vpack.c.bf16 %v3633_v48, %v3633_v48 }
 0x587   :  { %3710 = vmatprep.subr.bf16.mxu1 %v3638_v25 }
 0x588   :  { %3711 = vmatpush1.bf16.xpose.msra.mxu1 %v3637_v32 }
 0x58f   :  { %3743 = vmatmul.mubr.bf16.vlgmr.msra.gmra.mrb[104].mxu1 %v3664_v8 }
 0x662   :  { %v3744_v30 = vpop.f32.mrb[104].mxu1 }
 0x663   :  { %v4101_v44 = vadd.f32 %v3744_v30, %v3640_v21  ;;  %v3746_v54 = vpop.f32.mrb[105].mxu1 }
 0x664   :  { %v3747_v55 = vpop.f32.mrb[106].mxu1 }
 0x665   :  { %3751 = vst.msk [vmem:[%s5131_s12] sm:$0x1] %vm3750_vm5, %v4101_v44  ;;  %v3748_v6 = vpop.f32.mrb[107].mxu1 }
 0x666   :  { %3756 = vsyncpa [#allocation4], 1 }

</bundles_post_ra>
